<compile_context>
chip_gen: v5e
topology: v5e:2x2
jax: 0.10.0
libtpu: 0.0.40
codegen_flags: <defaults>
</compile_context>

<pallas_src>
import functools

import jax
import jax.numpy as jnp
from jax.experimental import pallas as pl
from jax.experimental.pallas import tpu as pltpu


# ----------------------------- shared math helpers ---------------------------

def _layer_norm(x, w, b, eps=1e-5):
    mu = jnp.mean(x, axis=-1, keepdims=True)
    xc = x - mu
    var = jnp.mean(xc * xc, axis=-1, keepdims=True)
    return xc * jax.lax.rsqrt(var + eps) * w + b


# --------------------------------- the kernel --------------------------------

def encoder_kernel(n_heads, seq_len,
                   emb_ref, inm_ref, tgtm_ref, amask_ref,
                   pos_ref, blank_ref, pad_ref, cls_ref,
                   ln1w_ref, ln1b_ref,
                   wqkv_ref, bqkv_ref,
                   wo_ref, bo_ref,
                   ln2w_ref, ln2b_ref,
                   wfc_ref, bfc_ref, wpj_ref, bpj_ref,
                   lnpw_ref, lnpb_ref,
                   out_ref, x_scr, e_scr):
    layer = pl.program_id(1)
    n_layers = pl.num_programs(1)
    T, D = x_scr.shape                       # T = B_blk * S (flattened rows)
    S = seq_len
    Bb = T // S
    H = n_heads
    Dh = D // H
    scale = 1.0 / (Dh ** 0.5)
    bf16 = jnp.bfloat16
    f32 = jnp.float32

    # ---- layer 0 of this batch tile: mask merge, CLS + positional, cache e ----
    @pl.when(layer == 0)
    def _init():
        in_m = inm_ref[...] > 0.5                        # [Bb, N, 1]
        tg_m = tgtm_ref[...] > 0.5
        neither = jnp.logical_not(jnp.logical_or(in_m, tg_m))
        e = jnp.where(neither, pad_ref[0], emb_ref[...])
        e = jnp.where(tg_m, blank_ref[0], e)
        e_scr[...] = e                                   # cached for the final merge
        pos = pos_ref[0]                                 # [S, D]
        cls_row = cls_ref[0] + pos[0:1, :]               # [1, D]
        for b in range(Bb):                              # small unrolled loop (layer 0 only)
            x_scr[b * S:b * S + 1, :] = cls_row
            x_scr[b * S + 1:(b + 1) * S, :] = e_scr[b] + pos[1:, :]

    # ---- one pre-norm residual attention block on the resident [T, D] state ----
    x = x_scr[...]                                       # [T, D] f32

    # fused QKV projection: single [T, D] @ [D, 3D] bf16 matmul, f32 accumulate
    y = _layer_norm(x, ln1w_ref[0], ln1b_ref[0])
    qkv = jnp.dot(y.astype(bf16), wqkv_ref[0],
                  preferred_element_type=f32) + bqkv_ref[0]      # [T, 3D]

    # split heads only after the projection (static lane slices, stacked head-major)
    def head_stack(base):
        return jnp.stack(
            [qkv[:, base + h * Dh: base + (h + 1) * Dh] for h in range(H)], axis=0)

    qh = head_stack(0)                                   # [H, T, Dh]
    kh = head_stack(D)
    vh = head_stack(2 * D)

    # block-diagonal masked attention over the flattened T rows: batch elements
    # cannot attend across each other (additive -1e30 mask), so one batched
    # einsum per step gives lane-dense [T, T] MXU outputs.
    s = jnp.einsum("htd,hrd->htr", qh.astype(bf16), kh.astype(bf16),
                   preferred_element_type=f32)           # [H, T, T]
    s = s * scale + amask_ref[...]
    m = jnp.max(s, axis=-1, keepdims=True)
    e_ = jnp.exp(s - m)
    p = e_ * pl.reciprocal(jnp.sum(e_, axis=-1, keepdims=True), approx=True)
    o = jnp.einsum("htr,hrd->htd", p.astype(bf16), vh.astype(bf16),
                   preferred_element_type=f32)           # [H, T, Dh]

    # out-projection: per-head lane-dense [Dh, D] weights, summed over heads.
    oproj = jnp.einsum("htd,hde->hte", o.astype(bf16), wo_ref[0],
                       preferred_element_type=f32)       # [H, T, D]
    # TODO(synk): attention dropout (p=0.2) and the unused cls_head are
    # train-time / unused-by-forward pieces; eval forward only.
    x = x + jnp.sum(oproj, axis=0) + bo_ref[0]

    # MLP branch: two fused 2-D matmuls, QuickGELU in f32
    y2 = _layer_norm(x, ln2w_ref[0], ln2b_ref[0])
    hmid = jnp.dot(y2.astype(bf16), wfc_ref[0],
                   preferred_element_type=f32) + bfc_ref[0]      # [T, 4D]
    hmid = hmid * jax.nn.sigmoid(1.702 * hmid)
    x = x + jnp.dot(hmid.astype(bf16), wpj_ref[0],
                    preferred_element_type=f32) + bpj_ref[0]

    x_scr[...] = x

    # ---- last layer: ln_post, drop CLS, merge with target mask ----
    @pl.when(layer == n_layers - 1)
    def _final():
        for b in range(Bb):
            tgb = tgtm_ref[b] > 0.5                      # [N, 1]
            xb = _layer_norm(x_scr[b * S + 1:(b + 1) * S, :],
                             lnpw_ref[0], lnpb_ref[0])   # [N, D]
            out_ref[b] = jnp.where(tgb, xb, e_scr[b])


# ------------------------- host-side parameter preparation --------------------

def prepare_params(params, n_layers, n_heads):
    """PyTorch-layout params -> kernel layout (transposed, fused QKV, bf16)."""
    L = n_layers
    H = n_heads
    D = params["lnpost_w"].shape[-1]
    Dh = D // H
    bf16 = jnp.bfloat16

    # fused QKV weight: PyTorch [L, 3D, D] ([out, in]) -> [L, D, 3D]
    wqkv = jnp.transpose(params["qkv_w"], (0, 2, 1)).astype(bf16)
    bqkv = params["qkv_b"].reshape(L, 1, 3 * D).astype(jnp.float32)

    # out-proj: attn = concat_h(o_h) @ Wo.T + bo == sum_h o_h @ Wo.T[h*Dh:(h+1)*Dh]
    wo = jnp.transpose(params["outp_w"], (0, 2, 1)).reshape(L, H, Dh, D).astype(bf16)
    bo = params["outp_b"].reshape(L, 1, D)

    return {
        "pos": params["pos"], "blank": params["blank"],
        "pad": params["pad"], "cls": params["cls"],
        "ln1_w": params["ln1_w"].reshape(L, 1, D),
        "ln1_b": params["ln1_b"].reshape(L, 1, D),
        "wqkv": wqkv, "bqkv": bqkv,
        "wo": wo, "bo": bo,
        "ln2_w": params["ln2_w"].reshape(L, 1, D),
        "ln2_b": params["ln2_b"].reshape(L, 1, D),
        "wfc": jnp.transpose(params["fc_w"], (0, 2, 1)).astype(bf16),     # [L, D, 4D]
        "bfc": params["fc_b"].reshape(L, 1, 4 * D),
        "wpj": jnp.transpose(params["proj_w"], (0, 2, 1)).astype(bf16),   # [L, 4D, D]
        "bpj": params["proj_b"].reshape(L, 1, D),
        "lnp_w": params["lnpost_w"].reshape(1, 1, D),
        "lnp_b": params["lnpost_b"].reshape(1, 1, D),
    }


def _pick_batch_block(B, target=8):
    best = 1
    for cand in range(1, min(B, target) + 1):
        if B % cand == 0:
            best = cand
    return best


# --------------------------------- wrapper ------------------------------------

def encoder_pallas(params, embeddings, input_mask, target_mask,
                   n_layers, n_heads, batch_block=None):
    B, N, D = embeddings.shape
    S = N + 1
    H = n_heads
    Dh = D // H
    L = n_layers
    assert D % H == 0
    if batch_block is None:
        batch_block = _pick_batch_block(B)
    assert B % batch_block == 0, "batch_block must divide the batch size"
    Bb = batch_block
    T = Bb * S                                    # flattened rows per grid step

    pp = prepare_params(params, n_layers, n_heads)

    emb = embeddings.astype(jnp.float32)
    in_m = input_mask.astype(jnp.float32)[:, :, None]        # [B, N, 1]
    tg_m = target_mask.astype(jnp.float32)[:, :, None]       # [B, N, 1]

    # block-diagonal additive attention mask over the flattened batch tile
    ids = jnp.arange(T, dtype=jnp.int32) // S
    amask = jnp.where(ids[:, None] == ids[None, :], 0.0, -1e30).astype(jnp.float32)

    batch_map3 = lambda b, l: (b, 0, 0)
    const2 = lambda b, l: (0, 0)
    const3 = lambda b, l: (0, 0, 0)
    layer3 = lambda b, l: (l, 0, 0)
    layer4 = lambda b, l: (l, 0, 0, 0)

    in_specs = [
        pl.BlockSpec((Bb, N, D), batch_map3),     # embeddings
        pl.BlockSpec((Bb, N, 1), batch_map3),     # input mask
        pl.BlockSpec((Bb, N, 1), batch_map3),     # target mask
        pl.BlockSpec((T, T), const2),             # block-diag additive attn mask
        pl.BlockSpec((1, S, D), const3),          # positional
        pl.BlockSpec((1, 1, D), const3),          # blank
        pl.BlockSpec((1, 1, D), const3),          # padding
        pl.BlockSpec((1, 1, D), const3),          # cls
        pl.BlockSpec((1, 1, D), layer3),          # ln1_w
        pl.BlockSpec((1, 1, D), layer3),          # ln1_b
        pl.BlockSpec((1, D, 3 * D), layer3),      # wqkv (fused)
        pl.BlockSpec((1, 1, 3 * D), layer3),      # bqkv (fused)
        pl.BlockSpec((1, H, Dh, D), layer4),      # wo (per-head, lane-dense D)
        pl.BlockSpec((1, 1, D), layer3),          # bo
        pl.BlockSpec((1, 1, D), layer3),          # ln2_w
        pl.BlockSpec((1, 1, D), layer3),          # ln2_b
        pl.BlockSpec((1, D, 4 * D), layer3),      # wfc
        pl.BlockSpec((1, 1, 4 * D), layer3),      # bfc
        pl.BlockSpec((1, 4 * D, D), layer3),      # wpj
        pl.BlockSpec((1, 1, D), layer3),          # bpj
        pl.BlockSpec((1, 1, D), const3),          # lnpost_w
        pl.BlockSpec((1, 1, D), const3),          # lnpost_b
    ]

    steps = (B // Bb) * L
    flops = int(steps * (24 * T * D * D + 4 * T * T * D))
    transcendentals = int(steps * (H * T * T + 4 * T * D))
    weight_bytes = sum(int(v.size) * v.dtype.itemsize for v in pp.values())
    bytes_accessed = int((B // Bb) * weight_bytes
                         + 2 * B * N * D * 4 + 2 * B * N * 4 + T * T * 4)

    kernel = functools.partial(encoder_kernel, n_heads, S)
    return pl.pallas_call(
        kernel,
        grid=(B // Bb, L),
        in_specs=in_specs,
        out_specs=pl.BlockSpec((Bb, N, D), batch_map3),
        out_shape=jax.ShapeDtypeStruct((B, N, D), jnp.float32),
        scratch_shapes=[pltpu.VMEM((T, D), jnp.float32),      # resident state
                        pltpu.VMEM((Bb, N, D), jnp.float32)], # cached masked emb
        compiler_params=pltpu.CompilerParams(
            dimension_semantics=("parallel", "arbitrary"),
            # 48 MiB is safe on all generations (v7x has 64 MiB / TC).  On
            # v5e / v6e (128 MiB) this can be raised toward ~96 MiB for large D
            # so the MLP weight blocks stay deeply buffered.
            vmem_limit_bytes=48 * 1024 * 1024),
        cost_estimate=pl.CostEstimate(
            flops=flops, transcendentals=transcendentals,
            bytes_accessed=bytes_accessed),
    )(emb, in_m, tg_m, amask,
      pp["pos"], pp["blank"], pp["pad"], pp["cls"],
      pp["ln1_w"], pp["ln1_b"],
      pp["wqkv"], pp["bqkv"],
      pp["wo"], pp["bo"],
      pp["ln2_w"], pp["ln2_b"],
      pp["wfc"], pp["bfc"], pp["wpj"], pp["bpj"],
      pp["lnp_w"], pp["lnp_b"])


# ------------------------- pure-JAX reference (for checking) ------------------

def encoder_reference(params, embeddings, input_mask, target_mask,
                      n_layers, n_heads):
    emb = embeddings.astype(jnp.float32)
    B, N, D = emb.shape
    H = n_heads
    Dh = D // H
    S = N + 1
    in_m = input_mask[:, :, None]
    tg_m = target_mask[:, :, None]

    emb = jnp.where(jnp.logical_and(~in_m, ~tg_m), params["pad"], emb)
    emb = jnp.where(tg_m, params["blank"], emb)

    cls = jnp.broadcast_to(params["cls"], (B, 1, D))
    x = jnp.concatenate([cls, emb], axis=1) + params["pos"]

    def ln(v, w, b, eps=1e-5):
        mu = jnp.mean(v, axis=-1, keepdims=True)
        var = jnp.mean((v - mu) ** 2, axis=-1, keepdims=True)
        return (v - mu) * jax.lax.rsqrt(var + eps) * w + b

    def lin(v, w, b):   # PyTorch layout w: [Dout, Din]
        return jnp.einsum("bsd,ed->bse", v, w) + b

    for l in range(n_layers):
        y = ln(x, params["ln1_w"][l], params["ln1_b"][l])
        qkv = lin(y, params["qkv_w"][l], params["qkv_b"][l])
        q, k, v = jnp.split(qkv, 3, axis=-1)

        def heads(t):
            return t.reshape(B, S, H, Dh).transpose(0, 2, 1, 3)

        qh = heads(q) * (1.0 / Dh ** 0.5)
        kh = heads(k)
        vh = heads(v)
        s = jnp.einsum("bhqd,bhkd->bhqk", qh, kh)
        p = jax.nn.softmax(s, axis=-1)
        o = jnp.einsum("bhqk,bhkd->bhqd", p, vh)
        o = o.transpose(0, 2, 1, 3).reshape(B, S, D)
        x = x + lin(o, params["outp_w"][l], params["outp_b"][l])

        y = ln(x, params["ln2_w"][l], params["ln2_b"][l])
        h = lin(y, params["fc_w"][l], params["fc_b"][l])
        h = h * jax.nn.sigmoid(1.702 * h)
        x = x + lin(h, params["proj_w"][l], params["proj_b"][l])

    x = ln(x, params["lnpost_w"], params["lnpost_b"])
    return jnp.where(tg_m, x[:, 1:, :], emb)


# ---------------------------- parameter construction --------------------------

def make_params(key, n_categories, d_model, n_layers):
    D, L = d_model, n_layers
    ks = jax.random.split(key, 12)

    def nrm(k, shape, std=0.02):
        return (std * jax.random.normal(k, shape)).astype(jnp.float32)

    return {
        "pos":   nrm(ks[0], (1, n_categories + 1, D)),
        "blank": nrm(ks[1], (1, 1, D)),
        "pad":   nrm(ks[2], (1, 1, D)),
        "cls":   nrm(ks[3], (1, 1, D)),
        "ln1_w": jnp.ones((L, D), jnp.float32),
        "ln1_b": jnp.zeros((L, D), jnp.float32),
        "qkv_w": nrm(ks[4], (L, 3 * D, D)),
        "qkv_b": nrm(ks[5], (L, 3 * D)),
        "outp_w": nrm(ks[6], (L, D, D)),
        "outp_b": nrm(ks[7], (L, D)),
        "ln2_w": jnp.ones((L, D), jnp.float32),
        "ln2_b": jnp.zeros((L, D), jnp.float32),
        "fc_w": nrm(ks[8], (L, 4 * D, D)),
        "fc_b": nrm(ks[9], (L, 4 * D)),
        "proj_w": nrm(ks[10], (L, D, 4 * D)),
        "proj_b": nrm(ks[11], (L, D)),
        "lnpost_w": jnp.ones((D,), jnp.float32),
        "lnpost_b": jnp.zeros((D,), jnp.float32),
    }


# ------------------------------------ main ------------------------------------

if __name__ == "__main__":
    B = 4                # batch
    n_categories = 7     # sequence length is n_categories + 1 (CLS)
    d_model = 32
    n_heads = 4
    n_layers = 2
    batch_block = 2      # 2 batch tiles -> exercises the per-tile init/final path

    key = jax.random.PRNGKey(0)
    k_par, k_emb, k_in, k_tgt = jax.random.split(key, 4)

    params = make_params(k_par, n_categories, d_model, n_layers)

    embeddings = jax.random.normal(k_emb, (B, n_categories, d_model),
                                   dtype=jnp.float32)
    input_mask = jax.random.bernoulli(k_in, 0.6, (B, n_categories))
    target_mask = jnp.logical_and(
        jax.random.bernoulli(k_tgt, 0.3, (B, n_categories)),
        jnp.logical_not(input_mask))

    out = encoder_pallas(params, embeddings, input_mask, target_mask,
                         n_layers, n_heads, batch_block=batch_block)
    out = jax.block_until_ready(out)

    ref = encoder_reference(params, embeddings, input_mask, target_mask,
                            n_layers, n_heads)
    ref = jax.block_until_ready(ref)

    assert out.shape == (B, n_categories, d_model)
    # bf16 MXU inputs (f32 accumulation) vs. pure-f32 reference -> looser tol.
    assert jnp.allclose(out, ref, rtol=2e-2, atol=2e-2), "mismatch vs reference"
    print("KERNEL_OK")
</pallas_src>

<mosaic_0001>
module attributes {stable_mosaic.version = 11 : i64} {
  func.func @encoder_kernel(%arg0: i32, %arg1: i32, %arg2: memref<2x7x32xf32, #tpu.memory_space<vmem>>, %arg3: memref<2x7x1xf32, #tpu.memory_space<vmem>>, %arg4: memref<2x7x1xf32, #tpu.memory_space<vmem>>, %arg5: memref<16x16xf32, #tpu.memory_space<vmem>>, %arg6: memref<1x8x32xf32, #tpu.memory_space<vmem>>, %arg7: memref<1x1x32xf32, #tpu.memory_space<vmem>>, %arg8: memref<1x1x32xf32, #tpu.memory_space<vmem>>, %arg9: memref<1x1x32xf32, #tpu.memory_space<vmem>>, %arg10: memref<1x1x32xf32, #tpu.memory_space<vmem>>, %arg11: memref<1x1x32xf32, #tpu.memory_space<vmem>>, %arg12: memref<1x32x96xbf16, #tpu.memory_space<vmem>>, %arg13: memref<1x1x96xf32, #tpu.memory_space<vmem>>, %arg14: memref<1x4x8x32xbf16, #tpu.memory_space<vmem>>, %arg15: memref<1x1x32xf32, #tpu.memory_space<vmem>>, %arg16: memref<1x1x32xf32, #tpu.memory_space<vmem>>, %arg17: memref<1x1x32xf32, #tpu.memory_space<vmem>>, %arg18: memref<1x32x128xbf16, #tpu.memory_space<vmem>>, %arg19: memref<1x1x128xf32, #tpu.memory_space<vmem>>, %arg20: memref<1x128x32xbf16, #tpu.memory_space<vmem>>, %arg21: memref<1x1x32xf32, #tpu.memory_space<vmem>>, %arg22: memref<1x1x32xf32, #tpu.memory_space<vmem>>, %arg23: memref<1x1x32xf32, #tpu.memory_space<vmem>>, %arg24: memref<2x7x32xf32, #tpu.memory_space<vmem>>, %arg25: memref<16x32xf32, #tpu.memory_space<vmem>>, %arg26: memref<2x7x32xf32, #tpu.memory_space<vmem>>) attributes {dimension_semantics = [#tpu.dimension_semantics<parallel>, #tpu.dimension_semantics<arbitrary>], iteration_bounds = array<i64: 2, 2>, scalar_prefetch = 0 : i64, scratch_operands = 2 : i64, tpu.core_type = #tpu.core_type<tc>, window_params = [{transform_indices = @transform_0, window_bounds = array<i64: 2, 7, 32>}, {transform_indices = @transform_1, window_bounds = array<i64: 2, 7, 1>}, {transform_indices = @transform_2, window_bounds = array<i64: 2, 7, 1>}, {pipeline_mode = #tpu.pipeline_mode<synchronous>, transform_indices = @transform_3, window_bounds = array<i64: 16, 16>}, {pipeline_mode = #tpu.pipeline_mode<synchronous>, transform_indices = @transform_4, window_bounds = array<i64: 1, 8, 32>}, {pipeline_mode = #tpu.pipeline_mode<synchronous>, transform_indices = @transform_5, window_bounds = array<i64: 1, 1, 32>}, {pipeline_mode = #tpu.pipeline_mode<synchronous>, transform_indices = @transform_6, window_bounds = array<i64: 1, 1, 32>}, {pipeline_mode = #tpu.pipeline_mode<synchronous>, transform_indices = @transform_7, window_bounds = array<i64: 1, 1, 32>}, {transform_indices = @transform_8, window_bounds = array<i64: 1, 1, 32>}, {transform_indices = @transform_9, window_bounds = array<i64: 1, 1, 32>}, {transform_indices = @transform_10, window_bounds = array<i64: 1, 32, 96>}, {transform_indices = @transform_11, window_bounds = array<i64: 1, 1, 96>}, {transform_indices = @transform_12, window_bounds = array<i64: 1, 4, 8, 32>}, {transform_indices = @transform_13, window_bounds = array<i64: 1, 1, 32>}, {transform_indices = @transform_14, window_bounds = array<i64: 1, 1, 32>}, {transform_indices = @transform_15, window_bounds = array<i64: 1, 1, 32>}, {transform_indices = @transform_16, window_bounds = array<i64: 1, 32, 128>}, {transform_indices = @transform_17, window_bounds = array<i64: 1, 1, 128>}, {transform_indices = @transform_18, window_bounds = array<i64: 1, 128, 32>}, {transform_indices = @transform_19, window_bounds = array<i64: 1, 1, 32>}, {pipeline_mode = #tpu.pipeline_mode<synchronous>, transform_indices = @transform_20, window_bounds = array<i64: 1, 1, 32>}, {pipeline_mode = #tpu.pipeline_mode<synchronous>, transform_indices = @transform_21, window_bounds = array<i64: 1, 1, 32>}, {transform_indices = @transform_22, window_bounds = array<i64: 2, 7, 32>}]} {
    %c0_i32 = arith.constant 0 : i32
    %0 = arith.cmpi eq, %arg1, %c0_i32 : i32
    %1 = arith.extui %0 : i1 to i32
    %c0_i32_0 = arith.constant 0 : i32
    %2 = arith.cmpi ne, %1, %c0_i32_0 : i32
    scf.if %2 {
      %c0_65 = arith.constant 0 : index
      %c0_66 = arith.constant 0 : index
      %c0_67 = arith.constant 0 : index
      %148 = vector.load %arg3[%c0_65, %c0_66, %c0_67] : memref<2x7x1xf32, #tpu.memory_space<vmem>>, vector<2x7x1xf32>
      %cst_68 = arith.constant 5.000000e-01 : f32
      %149 = vector.broadcast %cst_68 : f32 to vector<2x7x1xf32>
      %150 = arith.cmpf ogt, %148, %149 : vector<2x7x1xf32>
      %c0_69 = arith.constant 0 : index
      %c0_70 = arith.constant 0 : index
      %c0_71 = arith.constant 0 : index
      %151 = vector.load %arg4[%c0_69, %c0_70, %c0_71] : memref<2x7x1xf32, #tpu.memory_space<vmem>>, vector<2x7x1xf32>
      %cst_72 = arith.constant 5.000000e-01 : f32
      %152 = vector.broadcast %cst_72 : f32 to vector<2x7x1xf32>
      %153 = arith.cmpf ogt, %151, %152 : vector<2x7x1xf32>
      %154 = arith.ori %150, %153 : vector<2x7x1xi1>
      %cst_73 = arith.constant dense<true> : vector<2x7x1xi1>
      %155 = arith.xori %154, %cst_73 : vector<2x7x1xi1>
      %c0_74 = arith.constant 0 : index
      %c0_75 = arith.constant 0 : index
      %c0_76 = arith.constant 0 : index
      %156 = vector.load %arg8[%c0_74, %c0_75, %c0_76] : memref<1x1x32xf32, #tpu.memory_space<vmem>>, vector<1x1x32xf32>
      %157 = vector.shape_cast %156 : vector<1x1x32xf32> to vector<1x32xf32>
      %c0_77 = arith.constant 0 : index
      %c0_78 = arith.constant 0 : index
      %c0_79 = arith.constant 0 : index
      %158 = vector.load %arg2[%c0_77, %c0_78, %c0_79] : memref<2x7x32xf32, #tpu.memory_space<vmem>>, vector<2x7x32xf32>
      %159 = vector.shape_cast %155 : vector<2x7x1xi1> to vector<2x7x1xi1>
      %160 = vector.broadcast %159 : vector<2x7x1xi1> to vector<2x7x32xi1>
      %161 = vector.shape_cast %157 : vector<1x32xf32> to vector<1x1x32xf32>
      %162 = vector.broadcast %161 : vector<1x1x32xf32> to vector<2x7x32xf32>
      %163 = arith.select %160, %162, %158 : vector<2x7x32xi1>, vector<2x7x32xf32>
      %c0_80 = arith.constant 0 : index
      %c0_81 = arith.constant 0 : index
      %c0_82 = arith.constant 0 : index
      %164 = vector.load %arg7[%c0_80, %c0_81, %c0_82] : memref<1x1x32xf32, #tpu.memory_space<vmem>>, vector<1x1x32xf32>
      %165 = vector.shape_cast %164 : vector<1x1x32xf32> to vector<1x32xf32>
      %166 = vector.shape_cast %153 : vector<2x7x1xi1> to vector<2x7x1xi1>
      %167 = vector.broadcast %166 : vector<2x7x1xi1> to vector<2x7x32xi1>
      %168 = vector.shape_cast %165 : vector<1x32xf32> to vector<1x1x32xf32>
      %169 = vector.broadcast %168 : vector<1x1x32xf32> to vector<2x7x32xf32>
      %170 = arith.select %167, %169, %163 : vector<2x7x32xi1>, vector<2x7x32xf32>
      %c0_83 = arith.constant 0 : index
      %c0_84 = arith.constant 0 : index
      %c0_85 = arith.constant 0 : index
      %171 = vector.load %arg26[%c0_83, %c0_84, %c0_85] : memref<2x7x32xf32, #tpu.memory_space<vmem>>, vector<2x7x32xf32>
      tpu.vector_store %arg26[%c0_83, %c0_84, %c0_85], %170 {strides = array<i32>} : memref<2x7x32xf32, #tpu.memory_space<vmem>>, vector<2x7x32xf32>,
      %c0_86 = arith.constant 0 : index
      %c0_87 = arith.constant 0 : index
      %c0_88 = arith.constant 0 : index
      %172 = vector.load %arg6[%c0_86, %c0_87, %c0_88] : memref<1x8x32xf32, #tpu.memory_space<vmem>>, vector<1x8x32xf32>
      %173 = vector.shape_cast %172 : vector<1x8x32xf32> to vector<8x32xf32>
      %c0_89 = arith.constant 0 : index
      %c0_90 = arith.constant 0 : index
      %c0_91 = arith.constant 0 : index
      %174 = vector.load %arg9[%c0_89, %c0_90, %c0_91] : memref<1x1x32xf32, #tpu.memory_space<vmem>>, vector<1x1x32xf32>
      %175 = vector.shape_cast %174 : vector<1x1x32xf32> to vector<1x32xf32>
      %176 = vector.extract_strided_slice %173 {offsets = [0, 0], sizes = [1, 32], strides = [1, 1]} : vector<8x32xf32> to vector<1x32xf32>
      %177 = arith.addf %175, %176 : vector<1x32xf32>
      %c0_92 = arith.constant 0 : index
      %c0_93 = arith.constant 0 : index
      %178 = vector.load %arg25[%c0_92, %c0_93] : memref<16x32xf32, #tpu.memory_space<vmem>>, vector<1x32xf32>
      tpu.vector_store %arg25[%c0_92, %c0_93], %177 {strides = array<i32>} : memref<16x32xf32, #tpu.memory_space<vmem>>, vector<1x32xf32>,
      %c0_94 = arith.constant 0 : index
      %c0_95 = arith.constant 0 : index
      %c0_96 = arith.constant 0 : index
      %179 = vector.load %arg26[%c0_94, %c0_95, %c0_96] : memref<2x7x32xf32, #tpu.memory_space<vmem>>, vector<1x7x32xf32>
      %180 = vector.shape_cast %179 : vector<1x7x32xf32> to vector<7x32xf32>
      %181 = vector.extract_strided_slice %173 {offsets = [1, 0], sizes = [7, 32], strides = [1, 1]} : vector<8x32xf32> to vector<7x32xf32>
      %182 = arith.addf %180, %181 : vector<7x32xf32>
      %c1 = arith.constant 1 : index
      %c0_97 = arith.constant 0 : index
      %183 = vector.load %arg25[%c1, %c0_97] : memref<16x32xf32, #tpu.memory_space<vmem>>, vector<7x32xf32>
      tpu.vector_store %arg25[%c1, %c0_97], %182 {strides = array<i32>} : memref<16x32xf32, #tpu.memory_space<vmem>>, vector<7x32xf32>,
      %c8 = arith.constant 8 : index
      %c0_98 = arith.constant 0 : index
      %184 = vector.load %arg25[%c8, %c0_98] : memref<16x32xf32, #tpu.memory_space<vmem>>, vector<1x32xf32>
      tpu.vector_store %arg25[%c8, %c0_98], %177 {strides = array<i32>} : memref<16x32xf32, #tpu.memory_space<vmem>>, vector<1x32xf32>,
      %c1_99 = arith.constant 1 : index
      %c0_100 = arith.constant 0 : index
      %c0_101 = arith.constant 0 : index
      %185 = vector.load %arg26[%c1_99, %c0_100, %c0_101] : memref<2x7x32xf32, #tpu.memory_space<vmem>>, vector<1x7x32xf32>
      %186 = vector.shape_cast %185 : vector<1x7x32xf32> to vector<7x32xf32>
      %187 = vector.extract_strided_slice %173 {offsets = [1, 0], sizes = [7, 32], strides = [1, 1]} : vector<8x32xf32> to vector<7x32xf32>
      %188 = arith.addf %186, %187 : vector<7x32xf32>
      %c9 = arith.constant 9 : index
      %c0_102 = arith.constant 0 : index
      %189 = vector.load %arg25[%c9, %c0_102] : memref<16x32xf32, #tpu.memory_space<vmem>>, vector<7x32xf32>
      tpu.vector_store %arg25[%c9, %c0_102], %188 {strides = array<i32>} : memref<16x32xf32, #tpu.memory_space<vmem>>, vector<7x32xf32>,
    } else {
    }
    %c0 = arith.constant 0 : index
    %c0_1 = arith.constant 0 : index
    %3 = vector.load %arg25[%c0, %c0_1] : memref<16x32xf32, #tpu.memory_space<vmem>>, vector<16x32xf32>
    %c0_2 = arith.constant 0 : index
    %c0_3 = arith.constant 0 : index
    %c0_4 = arith.constant 0 : index
    %4 = vector.load %arg10[%c0_2, %c0_3, %c0_4] : memref<1x1x32xf32, #tpu.memory_space<vmem>>, vector<1x1x32xf32>
    %5 = vector.shape_cast %4 : vector<1x1x32xf32> to vector<1x32xf32>
    %c0_5 = arith.constant 0 : index
    %c0_6 = arith.constant 0 : index
    %c0_7 = arith.constant 0 : index
    %6 = vector.load %arg11[%c0_5, %c0_6, %c0_7] : memref<1x1x32xf32, #tpu.memory_space<vmem>>, vector<1x1x32xf32>
    %7 = vector.shape_cast %6 : vector<1x1x32xf32> to vector<1x32xf32>
    %cst = arith.constant dense<0.000000e+00> : vector<16xf32>
    %8 = vector.multi_reduction <add>, %3, %cst [1] : vector<16x32xf32> to vector<16xf32>
    %9 = vector.shape_cast %8 : vector<16xf32> to vector<16x1xf32>
    %cst_8 = arith.constant 3.200000e+01 : f32
    %10 = vector.broadcast %cst_8 : f32 to vector<16x1xf32>
    %11 = arith.divf %9, %10 : vector<16x1xf32>
    %12 = vector.broadcast %11 : vector<16x1xf32> to vector<16x32xf32>
    %13 = arith.subf %3, %12 : vector<16x32xf32>
    %14 = arith.mulf %13, %13 : vector<16x32xf32>
    %cst_9 = arith.constant dense<0.000000e+00> : vector<16xf32>
    %15 = vector.multi_reduction <add>, %14, %cst_9 [1] : vector<16x32xf32> to vector<16xf32>
    %16 = vector.shape_cast %15 : vector<16xf32> to vector<16x1xf32>
    %cst_10 = arith.constant 3.200000e+01 : f32
    %17 = vector.broadcast %cst_10 : f32 to vector<16x1xf32>
    %18 = arith.divf %16, %17 : vector<16x1xf32>
    %cst_11 = arith.constant 9.99999974E-6 : f32
    %19 = vector.broadcast %cst_11 : f32 to vector<16x1xf32>
    %20 = arith.addf %18, %19 : vector<16x1xf32>
    %21 = math.rsqrt %20 : vector<16x1xf32>
    %22 = vector.broadcast %21 : vector<16x1xf32> to vector<16x32xf32>
    %23 = arith.mulf %13, %22 : vector<16x32xf32>
    %24 = vector.broadcast %5 : vector<1x32xf32> to vector<16x32xf32>
    %25 = arith.mulf %23, %24 : vector<16x32xf32>
    %26 = vector.broadcast %7 : vector<1x32xf32> to vector<16x32xf32>
    %27 = arith.addf %25, %26 : vector<16x32xf32>
    %28 = arith.truncf %27 : vector<16x32xf32> to vector<16x32xbf16>
    %c0_12 = arith.constant 0 : index
    %c0_13 = arith.constant 0 : index
    %c0_14 = arith.constant 0 : index
    %29 = vector.load %arg12[%c0_12, %c0_13, %c0_14] : memref<1x32x96xbf16, #tpu.memory_space<vmem>>, vector<1x32x96xbf16>
    %30 = vector.shape_cast %29 : vector<1x32x96xbf16> to vector<32x96xbf16>
    %cst_15 = arith.constant dense<0.000000e+00> : vector<16x96xf32>
    %31 = tpu.matmul %28, %30, %cst_15 {dimension_numbers = #tpu.dot_dimension_numbers<[1], [0], [0], [1], [0, 0, 1, 1], [], []>} : vector<16x32xbf16>, vector<32x96xbf16>, vector<16x96xf32> -> vector<16x96xf32>
    %c0_16 = arith.constant 0 : index
    %c0_17 = arith.constant 0 : index
    %c0_18 = arith.constant 0 : index
    %32 = vector.load %arg13[%c0_16, %c0_17, %c0_18] : memref<1x1x96xf32, #tpu.memory_space<vmem>>, vector<1x1x96xf32>
    %33 = vector.shape_cast %32 : vector<1x1x96xf32> to vector<1x96xf32>
    %34 = vector.broadcast %33 : vector<1x96xf32> to vector<16x96xf32>
    %35 = arith.addf %31, %34 : vector<16x96xf32>
    %36 = vector.extract_strided_slice %35 {offsets = [0, 0], sizes = [16, 8], strides = [1, 1]} : vector<16x96xf32> to vector<16x8xf32>
    %37 = vector.extract_strided_slice %35 {offsets = [0, 8], sizes = [16, 8], strides = [1, 1]} : vector<16x96xf32> to vector<16x8xf32>
    %38 = vector.extract_strided_slice %35 {offsets = [0, 16], sizes = [16, 8], strides = [1, 1]} : vector<16x96xf32> to vector<16x8xf32>
    %39 = vector.extract_strided_slice %35 {offsets = [0, 24], sizes = [16, 8], strides = [1, 1]} : vector<16x96xf32> to vector<16x8xf32>
    %40 = vector.shape_cast %36 : vector<16x8xf32> to vector<1x16x8xf32>
    %41 = vector.shape_cast %37 : vector<16x8xf32> to vector<1x16x8xf32>
    %42 = vector.shape_cast %38 : vector<16x8xf32> to vector<1x16x8xf32>
    %43 = vector.shape_cast %39 : vector<16x8xf32> to vector<1x16x8xf32>
    %44 = tpu.concatenate %40, %41, %42, %43 in 0 : vector<1x16x8xf32>, vector<1x16x8xf32>, vector<1x16x8xf32>, vector<1x16x8xf32> -> vector<4x16x8xf32>
    %45 = vector.extract_strided_slice %35 {offsets = [0, 32], sizes = [16, 8], strides = [1, 1]} : vector<16x96xf32> to vector<16x8xf32>
    %46 = vector.extract_strided_slice %35 {offsets = [0, 40], sizes = [16, 8], strides = [1, 1]} : vector<16x96xf32> to vector<16x8xf32>
    %47 = vector.extract_strided_slice %35 {offsets = [0, 48], sizes = [16, 8], strides = [1, 1]} : vector<16x96xf32> to vector<16x8xf32>
    %48 = vector.extract_strided_slice %35 {offsets = [0, 56], sizes = [16, 8], strides = [1, 1]} : vector<16x96xf32> to vector<16x8xf32>
    %49 = vector.shape_cast %45 : vector<16x8xf32> to vector<1x16x8xf32>
    %50 = vector.shape_cast %46 : vector<16x8xf32> to vector<1x16x8xf32>
    %51 = vector.shape_cast %47 : vector<16x8xf32> to vector<1x16x8xf32>
    %52 = vector.shape_cast %48 : vector<16x8xf32> to vector<1x16x8xf32>
    %53 = tpu.concatenate %49, %50, %51, %52 in 0 : vector<1x16x8xf32>, vector<1x16x8xf32>, vector<1x16x8xf32>, vector<1x16x8xf32> -> vector<4x16x8xf32>
    %54 = vector.extract_strided_slice %35 {offsets = [0, 64], sizes = [16, 8], strides = [1, 1]} : vector<16x96xf32> to vector<16x8xf32>
    %55 = vector.extract_strided_slice %35 {offsets = [0, 72], sizes = [16, 8], strides = [1, 1]} : vector<16x96xf32> to vector<16x8xf32>
    %56 = vector.extract_strided_slice %35 {offsets = [0, 80], sizes = [16, 8], strides = [1, 1]} : vector<16x96xf32> to vector<16x8xf32>
    %57 = vector.extract_strided_slice %35 {offsets = [0, 88], sizes = [16, 8], strides = [1, 1]} : vector<16x96xf32> to vector<16x8xf32>
    %58 = vector.shape_cast %54 : vector<16x8xf32> to vector<1x16x8xf32>
    %59 = vector.shape_cast %55 : vector<16x8xf32> to vector<1x16x8xf32>
    %60 = vector.shape_cast %56 : vector<16x8xf32> to vector<1x16x8xf32>
    %61 = vector.shape_cast %57 : vector<16x8xf32> to vector<1x16x8xf32>
    %62 = tpu.concatenate %58, %59, %60, %61 in 0 : vector<1x16x8xf32>, vector<1x16x8xf32>, vector<1x16x8xf32>, vector<1x16x8xf32> -> vector<4x16x8xf32>
    %63 = arith.truncf %44 : vector<4x16x8xf32> to vector<4x16x8xbf16>
    %64 = arith.truncf %53 : vector<4x16x8xf32> to vector<4x16x8xbf16>
    "tpu.trace_start"() <{level = 10 : i32, message = "htd,hrd->htr"}> : () -> ()
    %cst_19 = arith.constant dense<0.000000e+00> : vector<4x16x16xf32>
    %65 = tpu.matmul %63, %64, %cst_19 {dimension_numbers = #tpu.dot_dimension_numbers<[2], [2], [1], [1], [0, 0, 0, 1, 1, 1], [0], [0]>} : vector<4x16x8xbf16>, vector<4x16x8xbf16>, vector<4x16x16xf32> -> vector<4x16x16xf32>
    "tpu.trace_stop"() : () -> ()
    %cst_20 = arith.constant 0.353553385 : f32
    %66 = vector.broadcast %cst_20 : f32 to vector<4x16x16xf32>
    %67 = arith.mulf %65, %66 : vector<4x16x16xf32>
    %c0_21 = arith.constant 0 : index
    %c0_22 = arith.constant 0 : index
    %68 = vector.load %arg5[%c0_21, %c0_22] : memref<16x16xf32, #tpu.memory_space<vmem>>, vector<16x16xf32>
    %69 = vector.shape_cast %68 : vector<16x16xf32> to vector<1x16x16xf32>
    %70 = vector.broadcast %69 : vector<1x16x16xf32> to vector<4x16x16xf32>
    %71 = arith.addf %67, %70 : vector<4x16x16xf32>
    %cst_23 = arith.constant dense<0xFF800000> : vector<4x16xf32>
    %72 = vector.multi_reduction <maximumf>, %71, %cst_23 [2] : vector<4x16x16xf32> to vector<4x16xf32>
    %73 = vector.shape_cast %72 : vector<4x16xf32> to vector<4x16x1xf32>
    %74 = vector.broadcast %73 : vector<4x16x1xf32> to vector<4x16x16xf32>
    %75 = arith.subf %71, %74 : vector<4x16x16xf32>
    %76 = math.exp %75 : vector<4x16x16xf32>
    %cst_24 = arith.constant dense<0.000000e+00> : vector<4x16xf32>
    %77 = vector.multi_reduction <add>, %76, %cst_24 [2] : vector<4x16x16xf32> to vector<4x16xf32>
    %78 = vector.shape_cast %77 : vector<4x16xf32> to vector<4x16x1xf32>
    %79 = tpu.reciprocal %78 {approx = true} : vector<4x16x1xf32> -> vector<4x16x1xf32>
    %80 = vector.broadcast %79 : vector<4x16x1xf32> to vector<4x16x16xf32>
    %81 = arith.mulf %76, %80 : vector<4x16x16xf32>
    %82 = arith.truncf %81 : vector<4x16x16xf32> to vector<4x16x16xbf16>
    %83 = arith.truncf %62 : vector<4x16x8xf32> to vector<4x16x8xbf16>
    "tpu.trace_start"() <{level = 10 : i32, message = "htr,hrd->htd"}> : () -> ()
    %cst_25 = arith.constant dense<0.000000e+00> : vector<4x16x8xf32>
    %84 = tpu.matmul %82, %83, %cst_25 {dimension_numbers = #tpu.dot_dimension_numbers<[2], [1], [1], [2], [0, 0, 0, 1, 1, 2], [0], [0]>} : vector<4x16x16xbf16>, vector<4x16x8xbf16>, vector<4x16x8xf32> -> vector<4x16x8xf32>
    "tpu.trace_stop"() : () -> ()
    %85 = arith.truncf %84 : vector<4x16x8xf32> to vector<4x16x8xbf16>
    %c0_26 = arith.constant 0 : index
    %c0_27 = arith.constant 0 : index
    %c0_28 = arith.constant 0 : index
    %c0_29 = arith.constant 0 : index
    %86 = vector.load %arg14[%c0_26, %c0_27, %c0_28, %c0_29] : memref<1x4x8x32xbf16, #tpu.memory_space<vmem>>, vector<1x4x8x32xbf16>
    %87 = vector.shape_cast %86 : vector<1x4x8x32xbf16> to vector<4x8x32xbf16>
    "tpu.trace_start"() <{level = 10 : i32, message = "htd,hde->hte"}> : () -> ()
    %cst_30 = arith.constant dense<0.000000e+00> : vector<4x16x32xf32>
    %88 = tpu.matmul %85, %87, %cst_30 {dimension_numbers = #tpu.dot_dimension_numbers<[2], [1], [1], [2], [0, 0, 0, 1, 1, 2], [0], [0]>} : vector<4x16x8xbf16>, vector<4x8x32xbf16>, vector<4x16x32xf32> -> vector<4x16x32xf32>
    "tpu.trace_stop"() : () -> ()
    %cst_31 = arith.constant dense<0.000000e+00> : vector<16x32xf32>
    %89 = vector.multi_reduction <add>, %88, %cst_31 [0] : vector<4x16x32xf32> to vector<16x32xf32>
    %90 = arith.addf %3, %89 : vector<16x32xf32>
    %c0_32 = arith.constant 0 : index
    %c0_33 = arith.constant 0 : index
    %c0_34 = arith.constant 0 : index
    %91 = vector.load %arg15[%c0_32, %c0_33, %c0_34] : memref<1x1x32xf32, #tpu.memory_space<vmem>>, vector<1x1x32xf32>
    %92 = vector.shape_cast %91 : vector<1x1x32xf32> to vector<1x32xf32>
    %93 = vector.broadcast %92 : vector<1x32xf32> to vector<16x32xf32>
    %94 = arith.addf %90, %93 : vector<16x32xf32>
    %c0_35 = arith.constant 0 : index
    %c0_36 = arith.constant 0 : index
    %c0_37 = arith.constant 0 : index
    %95 = vector.load %arg16[%c0_35, %c0_36, %c0_37] : memref<1x1x32xf32, #tpu.memory_space<vmem>>, vector<1x1x32xf32>
    %96 = vector.shape_cast %95 : vector<1x1x32xf32> to vector<1x32xf32>
    %c0_38 = arith.constant 0 : index
    %c0_39 = arith.constant 0 : index
    %c0_40 = arith.constant 0 : index
    %97 = vector.load %arg17[%c0_38, %c0_39, %c0_40] : memref<1x1x32xf32, #tpu.memory_space<vmem>>, vector<1x1x32xf32>
    %98 = vector.shape_cast %97 : vector<1x1x32xf32> to vector<1x32xf32>
    %cst_41 = arith.constant dense<0.000000e+00> : vector<16xf32>
    %99 = vector.multi_reduction <add>, %94, %cst_41 [1] : vector<16x32xf32> to vector<16xf32>
    %100 = vector.shape_cast %99 : vector<16xf32> to vector<16x1xf32>
    %cst_42 = arith.constant 3.200000e+01 : f32
    %101 = vector.broadcast %cst_42 : f32 to vector<16x1xf32>
    %102 = arith.divf %100, %101 : vector<16x1xf32>
    %103 = vector.broadcast %102 : vector<16x1xf32> to vector<16x32xf32>
    %104 = arith.subf %94, %103 : vector<16x32xf32>
    %105 = arith.mulf %104, %104 : vector<16x32xf32>
    %cst_43 = arith.constant dense<0.000000e+00> : vector<16xf32>
    %106 = vector.multi_reduction <add>, %105, %cst_43 [1] : vector<16x32xf32> to vector<16xf32>
    %107 = vector.shape_cast %106 : vector<16xf32> to vector<16x1xf32>
    %cst_44 = arith.constant 3.200000e+01 : f32
    %108 = vector.broadcast %cst_44 : f32 to vector<16x1xf32>
    %109 = arith.divf %107, %108 : vector<16x1xf32>
    %cst_45 = arith.constant 9.99999974E-6 : f32
    %110 = vector.broadcast %cst_45 : f32 to vector<16x1xf32>
    %111 = arith.addf %109, %110 : vector<16x1xf32>
    %112 = math.rsqrt %111 : vector<16x1xf32>
    %113 = vector.broadcast %112 : vector<16x1xf32> to vector<16x32xf32>
    %114 = arith.mulf %104, %113 : vector<16x32xf32>
    %115 = vector.broadcast %96 : vector<1x32xf32> to vector<16x32xf32>
    %116 = arith.mulf %114, %115 : vector<16x32xf32>
    %117 = vector.broadcast %98 : vector<1x32xf32> to vector<16x32xf32>
    %118 = arith.addf %116, %117 : vector<16x32xf32>
    %119 = arith.truncf %118 : vector<16x32xf32> to vector<16x32xbf16>
    %c0_46 = arith.constant 0 : index
    %c0_47 = arith.constant 0 : index
    %c0_48 = arith.constant 0 : index
    %120 = vector.load %arg18[%c0_46, %c0_47, %c0_48] : memref<1x32x128xbf16, #tpu.memory_space<vmem>>, vector<1x32x128xbf16>
    %121 = vector.shape_cast %120 : vector<1x32x128xbf16> to vector<32x128xbf16>
    %cst_49 = arith.constant dense<0.000000e+00> : vector<16x128xf32>
    %122 = tpu.matmul %119, %121, %cst_49 {dimension_numbers = #tpu.dot_dimension_numbers<[1], [0], [0], [1], [0, 0, 1, 1], [], []>} : vector<16x32xbf16>, vector<32x128xbf16>, vector<16x128xf32> -> vector<16x128xf32>
    %c0_50 = arith.constant 0 : index
    %c0_51 = arith.constant 0 : index
    %c0_52 = arith.constant 0 : index
    %123 = vector.load %arg19[%c0_50, %c0_51, %c0_52] : memref<1x1x128xf32, #tpu.memory_space<vmem>>, vector<1x1x128xf32>
    %124 = vector.shape_cast %123 : vector<1x1x128xf32> to vector<1x128xf32>
    %125 = vector.broadcast %124 : vector<1x128xf32> to vector<16x128xf32>
    %126 = arith.addf %122, %125 : vector<16x128xf32>
    %cst_53 = arith.constant 1.702000e+00 : f32
    %127 = vector.broadcast %cst_53 : f32 to vector<16x128xf32>
    %128 = arith.mulf %127, %126 : vector<16x128xf32>
    %129 = arith.negf %128 : vector<16x128xf32>
    %130 = math.exp %129 : vector<16x128xf32>
    %cst_54 = arith.constant 1.000000e+00 : f32
    %131 = vector.broadcast %cst_54 : f32 to vector<16x128xf32>
    %132 = arith.addf %131, %130 : vector<16x128xf32>
    %133 = arith.divf %131, %132 : vector<16x128xf32>
    %134 = arith.mulf %126, %133 : vector<16x128xf32>
    %135 = arith.truncf %134 : vector<16x128xf32> to vector<16x128xbf16>
    %c0_55 = arith.constant 0 : index
    %c0_56 = arith.constant 0 : index
    %c0_57 = arith.constant 0 : index
    %136 = vector.load %arg20[%c0_55, %c0_56, %c0_57] : memref<1x128x32xbf16, #tpu.memory_space<vmem>>, vector<1x128x32xbf16>
    %137 = vector.shape_cast %136 : vector<1x128x32xbf16> to vector<128x32xbf16>
    %cst_58 = arith.constant dense<0.000000e+00> : vector<16x32xf32>
    %138 = tpu.matmul %135, %137, %cst_58 {dimension_numbers = #tpu.dot_dimension_numbers<[1], [0], [0], [1], [0, 0, 1, 1], [], []>} : vector<16x128xbf16>, vector<128x32xbf16>, vector<16x32xf32> -> vector<16x32xf32>
    %139 = arith.addf %94, %138 : vector<16x32xf32>
    %c0_59 = arith.constant 0 : index
    %c0_60 = arith.constant 0 : index
    %c0_61 = arith.constant 0 : index
    %140 = vector.load %arg21[%c0_59, %c0_60, %c0_61] : memref<1x1x32xf32, #tpu.memory_space<vmem>>, vector<1x1x32xf32>
    %141 = vector.shape_cast %140 : vector<1x1x32xf32> to vector<1x32xf32>
    %142 = vector.broadcast %141 : vector<1x32xf32> to vector<16x32xf32>
    %143 = arith.addf %139, %142 : vector<16x32xf32>
    %c0_62 = arith.constant 0 : index
    %c0_63 = arith.constant 0 : index
    %144 = vector.load %arg25[%c0_62, %c0_63] : memref<16x32xf32, #tpu.memory_space<vmem>>, vector<16x32xf32>
    tpu.vector_store %arg25[%c0_62, %c0_63], %143 {strides = array<i32>} : memref<16x32xf32, #tpu.memory_space<vmem>>, vector<16x32xf32>,
    %c1_i32 = arith.constant 1 : i32
    %145 = arith.cmpi eq, %arg1, %c1_i32 : i32
    %146 = arith.extui %145 : i1 to i32
    %c0_i32_64 = arith.constant 0 : i32
    %147 = arith.cmpi ne, %146, %c0_i32_64 : i32
    scf.if %147 {
      %c0_65 = arith.constant 0 : index
      %c0_66 = arith.constant 0 : index
      %c0_67 = arith.constant 0 : index
      %148 = vector.load %arg4[%c0_65, %c0_66, %c0_67] : memref<2x7x1xf32, #tpu.memory_space<vmem>>, vector<1x7x1xf32>
      %149 = vector.shape_cast %148 : vector<1x7x1xf32> to vector<7x1xf32>
      %cst_68 = arith.constant 5.000000e-01 : f32
      %150 = vector.broadcast %cst_68 : f32 to vector<7x1xf32>
      %151 = arith.cmpf ogt, %149, %150 : vector<7x1xf32>
      %c1 = arith.constant 1 : index
      %c0_69 = arith.constant 0 : index
      %152 = vector.load %arg25[%c1, %c0_69] : memref<16x32xf32, #tpu.memory_space<vmem>>, vector<7x32xf32>
      %c0_70 = arith.constant 0 : index
      %c0_71 = arith.constant 0 : index
      %c0_72 = arith.constant 0 : index
      %153 = vector.load %arg22[%c0_70, %c0_71, %c0_72] : memref<1x1x32xf32, #tpu.memory_space<vmem>>, vector<1x1x32xf32>
      %154 = vector.shape_cast %153 : vector<1x1x32xf32> to vector<1x32xf32>
      %c0_73 = arith.constant 0 : index
      %c0_74 = arith.constant 0 : index
      %c0_75 = arith.constant 0 : index
      %155 = vector.load %arg23[%c0_73, %c0_74, %c0_75] : memref<1x1x32xf32, #tpu.memory_space<vmem>>, vector<1x1x32xf32>
      %156 = vector.shape_cast %155 : vector<1x1x32xf32> to vector<1x32xf32>
      %cst_76 = arith.constant dense<0.000000e+00> : vector<7xf32>
      %157 = vector.multi_reduction <add>, %152, %cst_76 [1] : vector<7x32xf32> to vector<7xf32>
      %158 = vector.shape_cast %157 : vector<7xf32> to vector<7x1xf32>
      %cst_77 = arith.constant 3.200000e+01 : f32
      %159 = vector.broadcast %cst_77 : f32 to vector<7x1xf32>
      %160 = arith.divf %158, %159 : vector<7x1xf32>
      %161 = vector.broadcast %160 : vector<7x1xf32> to vector<7x32xf32>
      %162 = arith.subf %152, %161 : vector<7x32xf32>
      %163 = arith.mulf %162, %162 : vector<7x32xf32>
      %cst_78 = arith.constant dense<0.000000e+00> : vector<7xf32>
      %164 = vector.multi_reduction <add>, %163, %cst_78 [1] : vector<7x32xf32> to vector<7xf32>
      %165 = vector.shape_cast %164 : vector<7xf32> to vector<7x1xf32>
      %cst_79 = arith.constant 3.200000e+01 : f32
      %166 = vector.broadcast %cst_79 : f32 to vector<7x1xf32>
      %167 = arith.divf %165, %166 : vector<7x1xf32>
      %cst_80 = arith.constant 9.99999974E-6 : f32
      %168 = vector.broadcast %cst_80 : f32 to vector<7x1xf32>
      %169 = arith.addf %167, %168 : vector<7x1xf32>
      %170 = math.rsqrt %169 : vector<7x1xf32>
      %171 = vector.broadcast %170 : vector<7x1xf32> to vector<7x32xf32>
      %172 = arith.mulf %162, %171 : vector<7x32xf32>
      %173 = vector.broadcast %154 : vector<1x32xf32> to vector<7x32xf32>
      %174 = arith.mulf %172, %173 : vector<7x32xf32>
      %175 = vector.broadcast %156 : vector<1x32xf32> to vector<7x32xf32>
      %176 = arith.addf %174, %175 : vector<7x32xf32>
      %c0_81 = arith.constant 0 : index
      %c0_82 = arith.constant 0 : index
      %c0_83 = arith.constant 0 : index
      %177 = vector.load %arg26[%c0_81, %c0_82, %c0_83] : memref<2x7x32xf32, #tpu.memory_space<vmem>>, vector<1x7x32xf32>
      %178 = vector.shape_cast %177 : vector<1x7x32xf32> to vector<7x32xf32>
      %179 = vector.shape_cast %151 : vector<7x1xi1> to vector<7x1xi1>
      %180 = vector.broadcast %179 : vector<7x1xi1> to vector<7x32xi1>
      %181 = arith.select %180, %176, %178 : vector<7x32xi1>, vector<7x32xf32>
      %c0_84 = arith.constant 0 : index
      %c0_85 = arith.constant 0 : index
      %c0_86 = arith.constant 0 : index
      %182 = vector.load %arg24[%c0_84, %c0_85, %c0_86] : memref<2x7x32xf32, #tpu.memory_space<vmem>>, vector<1x7x32xf32>
      %183 = vector.shape_cast %182 : vector<1x7x32xf32> to vector<7x32xf32>
      %184 = vector.shape_cast %181 : vector<7x32xf32> to vector<1x7x32xf32>
      tpu.vector_store %arg24[%c0_84, %c0_85, %c0_86], %184 {strides = array<i32>} : memref<2x7x32xf32, #tpu.memory_space<vmem>>, vector<1x7x32xf32>,
      %c1_87 = arith.constant 1 : index
      %c0_88 = arith.constant 0 : index
      %c0_89 = arith.constant 0 : index
      %185 = vector.load %arg4[%c1_87, %c0_88, %c0_89] : memref<2x7x1xf32, #tpu.memory_space<vmem>>, vector<1x7x1xf32>
      %186 = vector.shape_cast %185 : vector<1x7x1xf32> to vector<7x1xf32>
      %cst_90 = arith.constant 5.000000e-01 : f32
      %187 = vector.broadcast %cst_90 : f32 to vector<7x1xf32>
      %188 = arith.cmpf ogt, %186, %187 : vector<7x1xf32>
      %c9 = arith.constant 9 : index
      %c0_91 = arith.constant 0 : index
      %189 = vector.load %arg25[%c9, %c0_91] : memref<16x32xf32, #tpu.memory_space<vmem>>, vector<7x32xf32>
      %c0_92 = arith.constant 0 : index
      %c0_93 = arith.constant 0 : index
      %c0_94 = arith.constant 0 : index
      %190 = vector.load %arg22[%c0_92, %c0_93, %c0_94] : memref<1x1x32xf32, #tpu.memory_space<vmem>>, vector<1x1x32xf32>
      %191 = vector.shape_cast %190 : vector<1x1x32xf32> to vector<1x32xf32>
      %c0_95 = arith.constant 0 : index
      %c0_96 = arith.constant 0 : index
      %c0_97 = arith.constant 0 : index
      %192 = vector.load %arg23[%c0_95, %c0_96, %c0_97] : memref<1x1x32xf32, #tpu.memory_space<vmem>>, vector<1x1x32xf32>
      %193 = vector.shape_cast %192 : vector<1x1x32xf32> to vector<1x32xf32>
      %cst_98 = arith.constant dense<0.000000e+00> : vector<7xf32>
      %194 = vector.multi_reduction <add>, %189, %cst_98 [1] : vector<7x32xf32> to vector<7xf32>
      %195 = vector.shape_cast %194 : vector<7xf32> to vector<7x1xf32>
      %cst_99 = arith.constant 3.200000e+01 : f32
      %196 = vector.broadcast %cst_99 : f32 to vector<7x1xf32>
      %197 = arith.divf %195, %196 : vector<7x1xf32>
      %198 = vector.broadcast %197 : vector<7x1xf32> to vector<7x32xf32>
      %199 = arith.subf %189, %198 : vector<7x32xf32>
      %200 = arith.mulf %199, %199 : vector<7x32xf32>
      %cst_100 = arith.constant dense<0.000000e+00> : vector<7xf32>
      %201 = vector.multi_reduction <add>, %200, %cst_100 [1] : vector<7x32xf32> to vector<7xf32>
      %202 = vector.shape_cast %201 : vector<7xf32> to vector<7x1xf32>
      %cst_101 = arith.constant 3.200000e+01 : f32
      %203 = vector.broadcast %cst_101 : f32 to vector<7x1xf32>
      %204 = arith.divf %202, %203 : vector<7x1xf32>
      %cst_102 = arith.constant 9.99999974E-6 : f32
      %205 = vector.broadcast %cst_102 : f32 to vector<7x1xf32>
      %206 = arith.addf %204, %205 : vector<7x1xf32>
      %207 = math.rsqrt %206 : vector<7x1xf32>
      %208 = vector.broadcast %207 : vector<7x1xf32> to vector<7x32xf32>
      %209 = arith.mulf %199, %208 : vector<7x32xf32>
      %210 = vector.broadcast %191 : vector<1x32xf32> to vector<7x32xf32>
      %211 = arith.mulf %209, %210 : vector<7x32xf32>
      %212 = vector.broadcast %193 : vector<1x32xf32> to vector<7x32xf32>
      %213 = arith.addf %211, %212 : vector<7x32xf32>
      %c1_103 = arith.constant 1 : index
      %c0_104 = arith.constant 0 : index
      %c0_105 = arith.constant 0 : index
      %214 = vector.load %arg26[%c1_103, %c0_104, %c0_105] : memref<2x7x32xf32, #tpu.memory_space<vmem>>, vector<1x7x32xf32>
      %215 = vector.shape_cast %214 : vector<1x7x32xf32> to vector<7x32xf32>
      %216 = vector.shape_cast %188 : vector<7x1xi1> to vector<7x1xi1>
      %217 = vector.broadcast %216 : vector<7x1xi1> to vector<7x32xi1>
      %218 = arith.select %217, %213, %215 : vector<7x32xi1>, vector<7x32xf32>
      %c1_106 = arith.constant 1 : index
      %c0_107 = arith.constant 0 : index
      %c0_108 = arith.constant 0 : index
      %219 = vector.load %arg24[%c1_106, %c0_107, %c0_108] : memref<2x7x32xf32, #tpu.memory_space<vmem>>, vector<1x7x32xf32>
      %220 = vector.shape_cast %219 : vector<1x7x32xf32> to vector<7x32xf32>
      %221 = vector.shape_cast %218 : vector<7x32xf32> to vector<1x7x32xf32>
      tpu.vector_store %arg24[%c1_106, %c0_107, %c0_108], %221 {strides = array<i32>} : memref<2x7x32xf32, #tpu.memory_space<vmem>>, vector<1x7x32xf32>,
    } else {
    }
    return
  }
  func.func @transform_0(%arg0: i32, %arg1: i32) -> (i32, i32, i32) {
    %c0_i32 = arith.constant 0 : i32
    %c0_i32_0 = arith.constant 0 : i32
    %c0_i32_1 = arith.constant 0 : i32
    return %arg0, %c0_i32, %c0_i32_0 : i32, i32, i32
  }
  func.func @transform_1(%arg0: i32, %arg1: i32) -> (i32, i32, i32) {
    %c0_i32 = arith.constant 0 : i32
    %c0_i32_0 = arith.constant 0 : i32
    %c0_i32_1 = arith.constant 0 : i32
    return %arg0, %c0_i32, %c0_i32_0 : i32, i32, i32
  }
  func.func @transform_2(%arg0: i32, %arg1: i32) -> (i32, i32, i32) {
    %c0_i32 = arith.constant 0 : i32
    %c0_i32_0 = arith.constant 0 : i32
    %c0_i32_1 = arith.constant 0 : i32
    return %arg0, %c0_i32, %c0_i32_0 : i32, i32, i32
  }
  func.func @transform_3(%arg0: i32, %arg1: i32) -> (i32, i32) {
    %c0_i32 = arith.constant 0 : i32
    %c0_i32_0 = arith.constant 0 : i32
    %c0_i32_1 = arith.constant 0 : i32
    return %c0_i32, %c0_i32_0 : i32, i32
  }
  func.func @transform_4(%arg0: i32, %arg1: i32) -> (i32, i32, i32) {
    %c0_i32 = arith.constant 0 : i32
    %c0_i32_0 = arith.constant 0 : i32
    %c0_i32_1 = arith.constant 0 : i32
    %c0_i32_2 = arith.constant 0 : i32
    return %c0_i32, %c0_i32_0, %c0_i32_1 : i32, i32, i32
  }
  func.func @transform_5(%arg0: i32, %arg1: i32) -> (i32, i32, i32) {
    %c0_i32 = arith.constant 0 : i32
    %c0_i32_0 = arith.constant 0 : i32
    %c0_i32_1 = arith.constant 0 : i32
    %c0_i32_2 = arith.constant 0 : i32
    return %c0_i32, %c0_i32_0, %c0_i32_1 : i32, i32, i32
  }
  func.func @transform_6(%arg0: i32, %arg1: i32) -> (i32, i32, i32) {
    %c0_i32 = arith.constant 0 : i32
    %c0_i32_0 = arith.constant 0 : i32
    %c0_i32_1 = arith.constant 0 : i32
    %c0_i32_2 = arith.constant 0 : i32
    return %c0_i32, %c0_i32_0, %c0_i32_1 : i32, i32, i32
  }
  func.func @transform_7(%arg0: i32, %arg1: i32) -> (i32, i32, i32) {
    %c0_i32 = arith.constant 0 : i32
    %c0_i32_0 = arith.constant 0 : i32
    %c0_i32_1 = arith.constant 0 : i32
    %c0_i32_2 = arith.constant 0 : i32
    return %c0_i32, %c0_i32_0, %c0_i32_1 : i32, i32, i32
  }
  func.func @transform_8(%arg0: i32, %arg1: i32) -> (i32, i32, i32) {
    %c0_i32 = arith.constant 0 : i32
    %c0_i32_0 = arith.constant 0 : i32
    %c0_i32_1 = arith.constant 0 : i32
    return %arg1, %c0_i32, %c0_i32_0 : i32, i32, i32
  }
  func.func @transform_9(%arg0: i32, %arg1: i32) -> (i32, i32, i32) {
    %c0_i32 = arith.constant 0 : i32
    %c0_i32_0 = arith.constant 0 : i32
    %c0_i32_1 = arith.constant 0 : i32
    return %arg1, %c0_i32, %c0_i32_0 : i32, i32, i32
  }
  func.func @transform_10(%arg0: i32, %arg1: i32) -> (i32, i32, i32) {
    %c0_i32 = arith.constant 0 : i32
    %c0_i32_0 = arith.constant 0 : i32
    %c0_i32_1 = arith.constant 0 : i32
    return %arg1, %c0_i32, %c0_i32_0 : i32, i32, i32
  }
  func.func @transform_11(%arg0: i32, %arg1: i32) -> (i32, i32, i32) {
    %c0_i32 = arith.constant 0 : i32
    %c0_i32_0 = arith.constant 0 : i32
    %c0_i32_1 = arith.constant 0 : i32
    return %arg1, %c0_i32, %c0_i32_0 : i32, i32, i32
  }
  func.func @transform_12(%arg0: i32, %arg1: i32) -> (i32, i32, i32, i32) {
    %c0_i32 = arith.constant 0 : i32
    %c0_i32_0 = arith.constant 0 : i32
    %c0_i32_1 = arith.constant 0 : i32
    %c0_i32_2 = arith.constant 0 : i32
    return %arg1, %c0_i32, %c0_i32_0, %c0_i32_1 : i32, i32, i32, i32
  }
  func.func @transform_13(%arg0: i32, %arg1: i32) -> (i32, i32, i32) {
    %c0_i32 = arith.constant 0 : i32
    %c0_i32_0 = arith.constant 0 : i32
    %c0_i32_1 = arith.constant 0 : i32
    return %arg1, %c0_i32, %c0_i32_0 : i32, i32, i32
  }
  func.func @transform_14(%arg0: i32, %arg1: i32) -> (i32, i32, i32) {
    %c0_i32 = arith.constant 0 : i32
    %c0_i32_0 = arith.constant 0 : i32
    %c0_i32_1 = arith.constant 0 : i32
    return %arg1, %c0_i32, %c0_i32_0 : i32, i32, i32
  }
  func.func @transform_15(%arg0: i32, %arg1: i32) -> (i32, i32, i32) {
    %c0_i32 = arith.constant 0 : i32
    %c0_i32_0 = arith.constant 0 : i32
    %c0_i32_1 = arith.constant 0 : i32
    return %arg1, %c0_i32, %c0_i32_0 : i32, i32, i32
  }
  func.func @transform_16(%arg0: i32, %arg1: i32) -> (i32, i32, i32) {
    %c0_i32 = arith.constant 0 : i32
    %c0_i32_0 = arith.constant 0 : i32
    %c0_i32_1 = arith.constant 0 : i32
    return %arg1, %c0_i32, %c0_i32_0 : i32, i32, i32
  }
  func.func @transform_17(%arg0: i32, %arg1: i32) -> (i32, i32, i32) {
    %c0_i32 = arith.constant 0 : i32
    %c0_i32_0 = arith.constant 0 : i32
    %c0_i32_1 = arith.constant 0 : i32
    return %arg1, %c0_i32, %c0_i32_0 : i32, i32, i32
  }
  func.func @transform_18(%arg0: i32, %arg1: i32) -> (i32, i32, i32) {
    %c0_i32 = arith.constant 0 : i32
    %c0_i32_0 = arith.constant 0 : i32
    %c0_i32_1 = arith.constant 0 : i32
    return %arg1, %c0_i32, %c0_i32_0 : i32, i32, i32
  }
  func.func @transform_19(%arg0: i32, %arg1: i32) -> (i32, i32, i32) {
    %c0_i32 = arith.constant 0 : i32
    %c0_i32_0 = arith.constant 0 : i32
    %c0_i32_1 = arith.constant 0 : i32
    return %arg1, %c0_i32, %c0_i32_0 : i32, i32, i32
  }
  func.func @transform_20(%arg0: i32, %arg1: i32) -> (i32, i32, i32) {
    %c0_i32 = arith.constant 0 : i32
    %c0_i32_0 = arith.constant 0 : i32
    %c0_i32_1 = arith.constant 0 : i32
    %c0_i32_2 = arith.constant 0 : i32
    return %c0_i32, %c0_i32_0, %c0_i32_1 : i32, i32, i32
  }
  func.func @transform_21(%arg0: i32, %arg1: i32) -> (i32, i32, i32) {
    %c0_i32 = arith.constant 0 : i32
    %c0_i32_0 = arith.constant 0 : i32
    %c0_i32_1 = arith.constant 0 : i32
    %c0_i32_2 = arith.constant 0 : i32
    return %c0_i32, %c0_i32_0, %c0_i32_1 : i32, i32, i32
  }
  func.func @transform_22(%arg0: i32, %arg1: i32) -> (i32, i32, i32) {
    %c0_i32 = arith.constant 0 : i32
    %c0_i32_0 = arith.constant 0 : i32
    %c0_i32_1 = arith.constant 0 : i32
    return %arg0, %c0_i32, %c0_i32_0 : i32, i32, i32
  }
}

</mosaic_0001>

<bundles_post_ra>
// kernel: tpu_custom_call.1
= control target key start
LH: loop header
LB: loop body
LE: loop exit
PB: predicated region body
PF: predicated region fallthrough
CT: control target
= control target key end

     0   :  { %s2536_s28 = smov 0   ;;  %s2538_s29 = smov 0   ;;  %s2881_s0 = inlined_call_operand.vmem [shape: f32[4,7,32], index: 0, kind: input, shape index: {}]   ;;  %s2882_s1 = inlined_call_operand.vmem [shape: f32[4,7,1], index: 1, kind: input, shape index: {}]   ;;  %s2883_s2 = inlined_call_operand.vmem [shape: f32[4,7,1], index: 2, kind: input, shape index: {}]   ;;  %s2884_s3 = inlined_call_operand.vmem [shape: f32[16,16], index: 3, kind: input, shape index: {}]   ;;  %s2885_s4 = inlined_call_operand.vmem [shape: f32[1,8,32], index: 4, kind: input, shape index: {}]   ;;  %s2886_s5 = inlined_call_operand.vmem [shape: f32[1,1,32], index: 5, kind: input, shape index: {}]   ;;  %s2887_s6 = inlined_call_operand.vmem [shape: f32[1,1,32], index: 6, kind: input, shape index: {}]   ;;  %s2888_s7 = inlined_call_operand.vmem [shape: f32[1,1,32], index: 7, kind: input, shape index: {}]   ;;  %s2889_s8 = inlined_call_operand.vmem [shape: f32[2,1,32], index: 8, kind: input, shape index: {}]   ;;  %s2890_s9 = inlined_call_operand.vmem [shape: f32[2,1,32], index: 9, kind: input, shape index: {}]   ;;  %s2891_s10 = inlined_call_operand.vmem [shape: bf16[2,32,96], index: 10, kind: input, shape index: {}]   ;;  %s2892_s11 = inlined_call_operand.vmem [shape: f32[2,1,96], index: 11, kind: input, shape index: {}]   ;;  %s2893_s12 = inlined_call_operand.vmem [shape: bf16[2,4,8,32], index: 12, kind: input, shape index: {}]   ;;  %s2894_s13 = inlined_call_operand.vmem [shape: f32[2,1,32], index: 13, kind: input, shape index: {}]   ;;  %s2895_s14 = inlined_call_operand.vmem [shape: f32[2,1,32], index: 14, kind: input, shape index: {}]   ;;  %s2896_s15 = inlined_call_operand.vmem [shape: f32[2,1,32], index: 15, kind: input, shape index: {}]   ;;  %s2897_s16 = inlined_call_operand.vmem [shape: bf16[2,32,128], index: 16, kind: input, shape index: {}]   ;;  %s2898_s17 = inlined_call_operand.vmem [shape: f32[2,1,128], index: 17, kind: input, shape index: {}]   ;;  %s2899_s18 = inlined_call_operand.vmem [shape: bf16[2,128,32], index: 18, kind: input, shape index: {}]   ;;  %s2900_s19 = inlined_call_operand.vmem [shape: f32[2,1,32], index: 19, kind: input, shape index: {}]   ;;  %s2901_s20 = inlined_call_operand.vmem [shape: f32[1,1,32], index: 20, kind: input, shape index: {}]   ;;  %s2902_s21 = inlined_call_operand.vmem [shape: f32[1,1,32], index: 21, kind: input, shape index: {}]   ;;  %s2903_s22 = inlined_call_operand.vmem [shape: f32[4,7,32], index: 22, kind: output, shape index: {}]  }
   0x1   :  { %2912 = sst [smem:[#allocation11_spill]] %s2881_s0  ;;  %s2540_s30 = smov 0  }
   0x2   :  { %2913 = sst [smem:[#allocation12_spill]] %s2882_s1 }
   0x3   :  { %2914 = sst [smem:[#allocation13_spill]] %s2883_s2 }
   0x4   :  { %2915 = sst [smem:[#allocation14_spill]] %s2884_s3  ;;  %s2534_s3 = smov 0  }
   0x5   :  { %2916 = sst [smem:[#allocation15_spill]] %s2885_s4  ;;  %s2542_s4 = smov 0  }
   0x6   :  { %2917 = sst [smem:[#allocation16_spill]] %s2886_s5 }
   0x7   :  { %2918 = sst [smem:[#allocation17_spill]] %s2887_s6 }
   0x8   :  { %2919 = sst [smem:[#allocation18_spill]] %s2888_s7 }
   0x9   :  { %2920 = sst [smem:[#allocation19_spill]] %s2889_s8 }
   0xa   :  { %2921 = sst [smem:[#allocation20_spill]] %s2890_s9 }
   0xb   :  { %2922 = sst [smem:[#allocation21_spill]] %s2891_s10 }
   0xc   :  { %2923 = sst [smem:[#allocation22_spill]] %s2893_s12 }
   0xd   :  { %2924 = sst [smem:[#allocation23_spill]] %s2901_s20 }
   0xe   :  { %2925 = sst [smem:[#allocation24_spill]] %s2902_s21 }
   0xf   :  { %2926 = sst [smem:[#allocation25_spill]] %s2903_s22 }
  0x10 LB: > { %2927 = sst [smem:[#allocation4_spill]] %s2392_s3  ;;  %s41_s0 = sadd.s32 1, %s2400_s29  ;;  %s2408_s4 = sphi %s2542_s4, %s32_s4   ;;  %s2404_s30 = sphi %s2540_s30, %s2965_s30   ;;  %s2400_s29 = sphi %s2538_s29, %s2964_s29   ;;  %s2396_s28 = sphi %s2536_s28, %s2963_s28   ;;  %s2392_s3 = sphi %s2534_s3, %s2962_s3  }
  0x11   : > { %2928 = sst [smem:[#allocation5_spill]] %s2400_s29  ;;  %s44_s23 = sadd.s32 1, %s2404_s30 }
  0x12   : > { %2929 = sst [smem:[#allocation6_spill]] %s2404_s30  ;;  %p42_p0 = scmp.ge.s32.totalorder %s41_s0, 2 }
  0x13   : > { %2930 = sst [smem:[#allocation7_spill]] %s2408_s4  ;;  %p2131_p1 = scmp.ge.s32.totalorder %s2408_s4, 1 }
  0x14   : > { %p751_p2 = scmp.lt.s32.totalorder %s2408_s4, 5  ;;  %s2967_s0 = smov (%p42_p0, %s41_s0), 0 }
  0x15   : > { %2931 = sst [smem:[#allocation8_spill]] %s2967_s0  ;;  %s2969_s23 = smov (!%p42_p0, %s44_s23), %s2404_s30 }
  0x16   : > { %p752_p3 = pnand %p2131_p1, %p751_p2  ;;  %p46_p4 = scmp.ge.s32.totalorder %s2969_s23, 2 }
  0x18   : > { %s2971_s23 = smov (%p46_p4, %s2969_s23), 0  ;;  %755 = sbr.rel (%p752_p3) target bundleno = 2431 (0x97f), region = 108 }
  0x19   : > { %2932 = sst [smem:[#allocation9_spill]] %s2971_s23 }
  0x1d   : > { %s2132_s1 = sshll.u32 %s2396_s28, 1  ;;  %p885_p5 = scmp.lt.s32.totalorder %s2392_s3, 1 }
  0x1e   : > { %p868_p6 = scmp.lt.s32.totalorder %s2132_s1, 3  ;;  %s2935_s29 = sld [smem:[#allocation11_spill]] }
  0x1f   : > { %s2568_s5 = scalar_select %p885_p5, %s2392_s3, 1 }
  0x20   : > { %s2973_s1 = smov (!%p868_p6, %s2132_s1), 3  ;;  %s2936_s7 = sld [smem:[#allocation12_spill]] }
  0x21   : > { %s2133_s28 = sshll.u32 %s2973_s1, 3  ;;  %s2218_s23 = sshll.u32 %s2568_s5, 4 }
  0x22   : > { %s2937_s6 = sld [smem:[#allocation13_spill]]  ;;  %s2621_s1 = scalar_lea.vmem %s2897_s16, %s2218_s23 }
  0x23   : > { %s2938_s10 = sld [smem:[#allocation21_spill]]  ;;  %s920_s30 = scalar_lea.vmem %s2898_s17, %s2568_s5 }
  0x24   : > { %s2582_s4 = scalar_lea.vmem %s2935_s29, %s2133_s28  ;;  %s2940_s12 = sld [smem:[#allocation22_spill]] }
  0x25   : > { %s928_s8 = scalar_lea.vmem %s2900_s19, %s2568_s5 }
  0x26   : > { %s877_s3 = scalar_lea.vmem %s2936_s7, %s2133_s28 }
  0x28   : > { %s2590_s25 = scalar_lea.vmem %s2937_s6, %s2133_s28  ;;  %s2941_s6 = sld [smem:[#allocation25_spill]] }
  0x29   : > { %s2595_s2 = scalar_lea.vmem %s2938_s10, %s2218_s23 }
  0x2a   : > { %2939 = sst [smem:[#allocation10_spill]] %s2595_s2  ;;  %s2604_s9 = scalar_lea.vmem %s2940_s12, %s2218_s23 }
  0x2b   : > { %s2221_s12 = sshll.u32 %s2568_s5, 6  ;;  %s2942_s23 = sld [smem:[#allocation4_spill]] }
  0x2c   : > { %s2631_s21 = scalar_lea.vmem %s2899_s18, %s2221_s12 }
  0x2e   : > { %s2640_s2 = scalar_lea.vmem %s2941_s6, %s2133_s28 }
  0x31   : > { %p2148_p7 = scmp.ne.s32.totalorder %s2942_s23, 0 }
  0x32   : > { %s2943_s28 = sld [smem:[#allocation15_spill]] (!%p2148_p7) }
  0x33   : > { %939 = sbr.rel (%p2148_p7) target bundleno = 199 (0xc7), region = 112  ;;  %s2944_s27 = sld [smem:[#allocation18_spill]] (!%p2148_p7) }
  0x34   : > { %s2945_s7 = sld [smem:[#allocation17_spill]] (!%p2148_p7) }
  0x35   : > { %s2946_s24 = sld [smem:[#allocation16_spill]] (!%p2148_p7) }
  0x38   : > { %v944_v0 = vld [vmem:[%s2590_s25] sm:$0x7f]  ;;  %v2410_v2 = vmov 0   ;;  %v945_v3 = vld [vmem:[%s2590_s25 + $0x8] sm:$0x7f]  ;;  %vm2411_vm5 = vmmov 1  }
  0x39   : > { %v940_v1 = vld [vmem:[%s877_s3] sm:$0x7f]  ;;  %2284 = vset.pattern.permute.xlu1 %v2410_v2  ;;  %vm946_vm0 = vcmp.gt.f32.partialorder %v944_v0, 0.5  ;;  %2283 = vset.pattern.permute.xlu0 %v2410_v2  ;;  %v941_v4 = vld [vmem:[%s877_s3 + $0x8] sm:$0x7f]  ;;  %vm947_vm3 = vcmp.gt.f32.partialorder %v945_v3, 0.5 }
  0x3a   : > { %vm942_vm1 = vcmp.gt.f32.partialorder %v940_v1, 0.5  ;;  %v971_v5 = vsel %vm946_vm0, 1, %v2410_v2  ;;  %vm943_vm4 = vcmp.gt.f32.partialorder %v941_v4, 0.5  ;;  %v972_v7 = vsel %vm947_vm3, 1, %v2410_v2  ;;  %v989_v9 = vld [vmem:[%s2943_s28] sm:$0xff] }
  0x3b   : > { %vm948_vm2 = vmor %vm942_vm1, %vm946_vm0  ;;  %974 = vperm.xlu1 %2284, %v971_v5   ;;  %v990_v10 = vld [vmem:[%s2944_s27] sm:$0x1]  ;;  %vm992_vm9 = vcmask 253952   ;;  %vm986_vm11 = vcmask 260096   ;;  %v954_v20 = vld [vmem:[%s2582_s4 + $0x8] sm:$0x7f] }
  0x3c   : > { %vm950_vm6 = vmxor %vm948_vm2, %vm2411_vm5  ;;  %v991_v11 = vadd.f32 %v990_v10, %v989_v9  ;;  %v2285_v13 = vld [vmem:[%s2945_s7] ss:$0 sm:$0xff]  ;;  %v996_v21 = vrot.slane %v989_v9, 1 }
  0x3d   : > { %v955_v6 = vsel %vm950_vm6, 1, %v2410_v2  ;;  %vm949_vm7 = vmor %vm943_vm4, %vm947_vm3  ;;  %v953_v14 = vld [vmem:[%s2582_s4] sm:$0x7f] }
  0x3e   : > { %958 = vperm.xlu0 %2283, %v955_v6   ;;  %vm951_vm8 = vmxor %vm949_vm7, %vm2411_vm5  ;;  %993 = vst.msk [vmem:[#allocation2] sm:$0x1] %vm992_vm9, %v991_v11  ;;  %v2286_v15 = vld [vmem:[%s2946_s24] ss:$0 sm:$0xff] }
  0x3f   : > { %v956_v8 = vsel %vm951_vm8, 1, %v2410_v2  ;;  %1000 = vst.msk [vmem:[#allocation2 + $0x8] sm:$0x1] %vm992_vm9, %v991_v11 }
  0x43   : > { %977 = vperm.xlu1 %2284, %v972_v7  }
  0x46   : > { %961 = vperm.xlu0 %2283, %v956_v8  }
  0xad   : > { %v975_v12 = vpop.permute.xlu1 %974 }
  0xae   : > { %vm979_vm10 = vcmp.eq.s32.totalorder %v975_v12, 1 }
  0xb0   : > { %v959_v16 = vpop.permute.xlu0 %958 }
  0xb1   : > { %vm963_vm12 = vcmp.eq.s32.totalorder %v959_v16, 1 }
  0xb2   : > { %v968_v17 = vsel %vm963_vm12, %v2285_v13, %v953_v14 }
  0xb3   : > { %v984_v18 = vsel %vm979_vm10, %v2286_v15, %v968_v17 }
  0xb4   : > { %987 = vst.msk [vmem:[#allocation3] sm:$0x7f] %vm986_vm11, %v984_v18 }
  0xb5   : > { %v978_v19 = vpop.permute.xlu1 %977 }
  0xb6   : > { %vm980_vm14 = vcmp.eq.s32.totalorder %v978_v19, 1 }
  0xb8   : > { %v962_v22 = vpop.permute.xlu0 %961 }
  0xb9   : > { %vm964_vm13 = vcmp.eq.s32.totalorder %v962_v22, 1 }
  0xba   : > { %v969_v23 = vsel %vm964_vm13, %v2285_v13, %v954_v20 }
  0xbb   : > { %v994_v24 = vld [vmem:[#allocation3] sm:$0x7f]  ;;  %v985_v25 = vsel %vm980_vm14, %v2286_v15, %v969_v23 }
  0xbc   : > { %v998_v26 = vadd.f32 %v996_v21, %v994_v24  ;;  %988 = vst.msk [vmem:[#allocation3 + $0x8] sm:$0x7f] %vm986_vm11, %v985_v25 }
  0xbe   : > { %999 = vst.msk [vmem:[#allocation2 + $0x1] sm:$0x7f] %vm986_vm11, %v998_v26 }
  0xc3   : > { %v1002_v27 = vld [vmem:[#allocation3 + $0x8] sm:$0x7f] }
  0xc4   : > { %v1003_v28 = vadd.f32 %v1002_v27, %v996_v21 }
  0xc6   : > { %1004 = vst.msk [vmem:[#allocation2 + $0x9] sm:$0x7f] %vm986_vm11, %v1003_v28 }
  0xc7 PF: > { %v2663_v29 = vld [vmem:[#allocation2] sm:$0xff]  ;;  %vm1009_vm15 = vcmask 261120   ;;  %v2412_v33 = vmov 32.0   ;;  %s2947_s4 = sld [smem:[#allocation10_spill]]  ;;  %s2952_s7 = scalar_lea.vmem %s2892_s11, %s2568_s5  ;;  %vm1144_vm7 = vcmask 64512   ;;  %vm1264_vm8 = vcmask 130048  }
  0xc8   : > { %v1010_v30 = vsel %vm1009_vm15, %v2663_v29, 0.0  ;;  %2310 = vrcp.f32 %v2412_v33  ;;  %s2948_s10 = sld [smem:[#allocation19_spill]]  ;;  %v2304_v18 = vld [vmem:[%s2952_s7] ss:$0 sm:$0xff]  ;;  %s2413_s20 = smov 104   ;;  %vm1481_vm9 = vcmask 1043456  }
  0xc9   : > { %1011 = vadd.xlane.f32.xlu0 %v1010_v30  ;;  %s2950_s6 = sld [smem:[#allocation20_spill]]  ;;  %s2414_s22 = smov 120  }
  0xca   : > { %s2415_s24 = smov 112   ;;  %s2417_s3 = smov 64  }
  0xcb   : > { %s2955_s0 = scalar_lea.vmem %s2895_s14, %s2568_s5  ;;  %s2957_s26 = sld [smem:[#allocation4_spill]] }
  0xcd   : > { %v2667_v31 = vld [vmem:[#allocation2 + $0x8] sm:$0xff]  ;;  %v2222_v52 = vld [vmem:[%s2947_s4] sm:$0xff] }
  0xce   : > { %v1013_v32 = vsel %vm1009_vm15, %v2667_v31, 0.0  ;;  %v2311_v34 = vpop.eup %2310  ;;  %v2223_v50 = vld [vmem:[%s2947_s4 + $0x8] sm:$0xff]  ;;  %s2949_s12 = scalar_lea.vmem %s2948_s10, %s2568_s5  ;;  %s2416_s4 = smov 96  }
  0xcf   : > { %v1017_v35 = vmul.f32 32.0, %v2311_v34  ;;  %vm1021_vm0 = vweird.f32 %v2311_v34  ;;  %1101 = vmatpush.bf16.msra.mxu0 %v2223_v50  ;;  %v2302_v7 = vld [vmem:[%s2949_s12] ss:$0 sm:$0xff]  ;;  %s2951_s27 = scalar_lea.vmem %s2950_s6, %s2568_s5  ;;  %s2953_s10 = sld [smem:[#allocation14_spill]] }
  0xd0   : > { %v2303_v12 = vld [vmem:[%s2951_s27] ss:$0 sm:$0xff]  ;;  %s2954_s27 = scalar_lea.vmem %s2894_s13, %s2568_s5 }
  0xd1   : > { %1014 = vadd.xlane.f32.xlu0 %v1013_v32  ;;  %v1018_v36 = vsub.f32 1.0, %v1017_v35  ;;  %p2213_p8 = scmp.ne.s32.totalorder %s2957_s26, 1 }
  0xd2   : > { %s2959_s28 = sld [smem:[#allocation24_spill]] (!%p2213_p8) }
  0xd3   : > { %v1019_v37 = vmul.f32 %v2311_v34, %v1018_v36  ;;  %1102 = vmatpush.bf16.msra.mxu0 %v2222_v52 }
  0xd5   : > { %v1020_v38 = vadd.f32 %v2311_v34, %v1019_v37 }
  0xd7   : > { %v2671_v39 = vsel %vm1021_vm0, %v2311_v34, %v1020_v38 }
 0x13c   : > { %v1012_v40 = vpop.xlane.xlu0 %1011 }
 0x13d   : > { %v1023_v41 = vmul.f32 %v2671_v39, %v1012_v40 }
 0x13f   : > { %v1025_v42 = vsub.f32 %v2663_v29, %v1023_v41 }
 0x141   : > { %v1027_v43 = vmul.f32 %v1025_v42, %v1025_v42 }
 0x143   : > { %v1029_v44 = vsel %vm1009_vm15, %v1027_v43, 0.0 }
 0x144   : > { %1030 = vadd.xlane.f32.xlu1 %v1029_v44  ;;  %v1015_v45 = vpop.xlane.xlu0 %1014 }
 0x145   : > { %v1024_v46 = vmul.f32 %v2671_v39, %v1015_v45 }
 0x147   : > { %v1026_v47 = vsub.f32 %v2667_v31, %v1024_v46 }
 0x149   : > { %v1028_v48 = vmul.f32 %v1026_v47, %v1026_v47 }
 0x14b   : > { %v1032_v49 = vsel %vm1009_vm15, %v1028_v48, 0.0 }
 0x14c   : > { %1033 = vadd.xlane.f32.xlu1 %v1032_v49 }
 0x1b7   : > { %v1031_v51 = vpop.xlane.xlu1 %1030 }
 0x1b8   : > { %v1035_v53 = vmul.f32 %v1031_v51, %v2671_v39 }
 0x1ba   : > { %v1037_v54 = vadd.f32 1e-05, %v1035_v53 }
 0x1bc   : > { %2312 = vrsqrt.f32 %v1037_v54  ;;  %vm1045_vm2 = vweird.f32 %v1037_v54 }
 0x1bf   : > { %v1034_v55 = vpop.xlane.xlu1 %1033 }
 0x1c0   : > { %v1036_v56 = vmul.f32 %v1034_v55, %v2671_v39 }
 0x1c2   : > { %v2313_v57 = vpop.eup %2312  ;;  %v1038_v58 = vadd.f32 1e-05, %v1036_v56 }
 0x1c3   : > { %v1040_v59 = vmul.f32 %v2313_v57, %v1037_v54  ;;  %vm1046_vm1 = vweird.f32 %v2313_v57 }
 0x1c4   : > { %2314 = vrsqrt.f32 %v1038_v58  ;;  %vm1047_vm3 = vmor %vm1045_vm2, %vm1046_vm1  ;;  %vm1055_vm5 = vweird.f32 %v1038_v58 }
 0x1c5   : > { %v1041_v60 = vmul.f32 %v2313_v57, %v1040_v59 }
 0x1c7   : > { %v1042_v61 = vmul.f32 0.5, %v1041_v60 }
 0x1c9   : > { %v1043_v62 = vsub.f32 1.5, %v1042_v61 }
 0x1ca   : > { %v2315_v63 = vpop.eup %2314 }
 0x1cb   : > { %v1044_v0 = vmul.f32 %v2313_v57, %v1043_v62  ;;  %v1050_v1 = vmul.f32 %v2315_v63, %v1038_v58  ;;  %vm1056_vm4 = vweird.f32 %v2315_v63 }
 0x1cc   : > { %vm1057_vm6 = vmor %vm1055_vm5, %vm1056_vm4 }
 0x1cd   : > { %v1051_v2 = vmul.f32 %v2315_v63, %v1050_v1  ;;  %v1048_v3 = vsel %vm1047_vm3, %v2313_v57, %v1044_v0  ;;  %v1254_v0 = vld [vmem:[%s2953_s10] sm:$0xff] }
 0x1ce   : > { %v1059_v6 = vmul.f32 %v1048_v3, %v1025_v42 }
 0x1cf   : > { %v1052_v4 = vmul.f32 0.5, %v1051_v2 }
 0x1d0   : > { %v1064_v11 = vmul.f32 %v2302_v7, %v1059_v6 }
 0x1d1   : > { %v1053_v5 = vsub.f32 1.5, %v1052_v4 }
 0x1d2   : > { %v1069_v14 = vadd.f32 %v2303_v12, %v1064_v11 }
 0x1d3   : > { %v1054_v8 = vmul.f32 %v2315_v63, %v1053_v5 }
 0x1d5   : > { %v1058_v9 = vsel %vm1057_vm6, %v2315_v63, %v1054_v8 }
 0x1d6   : > { %v1060_v10 = vmul.f32 %v1058_v9, %v1026_v47 }
 0x1d8   : > { %v1065_v13 = vmul.f32 %v2302_v7, %v1060_v10 }
 0x1da   : > { %v1070_v15 = vadd.f32 %v2303_v12, %v1065_v13  ;;  %v1255_v12 = vld [vmem:[%s2953_s10 + $0x8] sm:$0xff] }
 0x1dc   : > { %v1071_v16 = vpack.c.bf16 %v1070_v15, %v1069_v14 }
 0x1de   : > { %2157 = vmatmul.msk.bf16.vlgmr.msra.gmra.mxu0 %vm1009_vm15, %v1071_v16 }
 0x25b   : > { %v1104_v17 = vpop.f32.mrf.mxu0 }
 0x25c   : > { %v1105_v19 = vadd.f32 %v2304_v18, %v1104_v17 }
 0x25e   : > { %v1129_v22 = vpack.c.bf16 %v1105_v19, %v1105_v19 }
 0x260   : > { %v1139_v25 = vunpack.c.l.b16 %v1129_v22 }
 0x263   : > { %v1106_v20 = vpop.f32.mrf.mxu0 }
 0x264   : > { %v1107_v21 = vadd.f32 %v2304_v18, %v1106_v20 }
 0x266   : > { %v2297_v23 = vpack.i.bf16 %v1107_v21, %v1105_v19  ;;  %v1130_v24 = vpack.c.bf16 %v1107_v21, %v1107_v21 }
 0x268   : > { %2298 = vrot.lane.b32.xlu0 %v2297_v23, %s2413_s20  ;;  %2288 = vrot.lane.b32.xlu2 %v2297_v23, %s2414_s22  ;;  %v1140_v26 = vunpack.c.l.b16 %v1130_v24  ;;  %s2956_s22 = scalar_lea.vmem %s2896_s15, %s2568_s5 }
 0x26a   : > { %v2699_v27 = vpack.c.b16 %v1140_v26, %v1139_v25 }
 0x270   : > { %2293 = vrot.lane.b32.xlu2 %v2297_v23, %s2415_s24 }
 0x2c2   : > { %v2289_v28 = vpop.permute.xlu2 %2288 }
 0x2c3   : > { %v2291_v30 = vunpack.i.h.bf16 %v2289_v28  ;;  %v2290_v32 = vunpack.i.l.bf16 %v2289_v28 }
 0x2c5   : > { %v1132_v33 = vpack.c.bf16 %v2291_v30, %v2291_v30  ;;  %v1131_v34 = vpack.c.bf16 %v2290_v32, %v2290_v32 }
 0x2c7   : > { %v1168_v35 = vunpack.c.l.b16 %v1132_v33  ;;  %v1167_v36 = vunpack.c.l.b16 %v1131_v34 }
 0x2c9   : > { %v2701_v37 = vpack.c.b16 %v1168_v35, %v1167_v36 }
 0x2ca   : > { %v2294_v38 = vpop.permute.xlu2 %2293 }
 0x2cb   : > { %v2296_v40 = vunpack.i.h.bf16 %v2294_v38  ;;  %v2295_v41 = vunpack.i.l.bf16 %v2294_v38  ;;  %1170 = vrot.lane.b32.xlu1 %v2701_v37, %s2416_s4 }
 0x2cd   : > { %v1134_v42 = vpack.c.bf16 %v2296_v40, %v2296_v40  ;;  %v1133_v43 = vpack.c.bf16 %v2295_v41, %v2295_v41 }
 0x2cf   : > { %v1195_v44 = vunpack.c.l.b16 %v1134_v42  ;;  %v1194_v45 = vunpack.c.l.b16 %v1133_v43 }
 0x2d1   : > { %v2704_v46 = vpack.c.b16 %v1195_v44, %v1194_v45 }
 0x2d3   : > { %1197 = vrot.lane.b32.xlu2 %v2704_v46, %s2416_s4 }
 0x2da   : > { %v2299_v47 = vpop.permute.xlu0 %2298 }
 0x2db   : > { %v2301_v48 = vunpack.i.h.bf16 %v2299_v47  ;;  %v2300_v49 = vunpack.i.l.bf16 %v2299_v47  ;;  %1142 = vrot.lane.b32.xlu2 %v2699_v27, %s2416_s4 }
 0x2dd   : > { %v1136_v50 = vpack.c.bf16 %v2301_v48, %v2301_v48  ;;  %v1135_v51 = vpack.c.bf16 %v2300_v49, %v2300_v49 }
 0x2df   : > { %v1222_v52 = vunpack.c.l.b16 %v1136_v50  ;;  %v1221_v53 = vunpack.c.l.b16 %v1135_v51 }
 0x2e1   : > { %v2708_v54 = vpack.c.b16 %v1222_v52, %v1221_v53 }
 0x2e3   : > { %1224 = vrot.lane.b32.xlu2 %v2708_v54, %s2416_s4 }
 0x32d   : > { %v1198_v55 = vpop.permute.xlu2 %1197 }
 0x32e   : > { %v1203_v62 = vsel %vm1144_vm7, %v1198_v55, 0 }
 0x335   : > { %v1143_v56 = vpop.permute.xlu2 %1142 }
 0x336   : > { %v1149_v57 = vsel %vm1144_vm7, %v1143_v56, 0 }
 0x337   : > { %1158 = vmatpush.bf16.xpose.msra.mxu1 %v1149_v57 }
 0x33d   : > { %v1171_v58 = vpop.permute.xlu1 %1170  ;;  %v1225_v59 = vpop.permute.xlu2 %1224 }
 0x33e   : > { %2158 = vmatmul.msk.bf16.vlgmr.msra.gmra.mxu1 %vm1144_vm7, %v2699_v27  ;;  %v1176_v60 = vsel %vm1144_vm7, %v1171_v58, 0  ;;  %v1230_v61 = vsel %vm1144_vm7, %v1225_v59, 0 }
 0x33f   : > { %1185 = vmatpush.bf16.xpose.msra.mxu3 %v1176_v60  ;;  %1239 = vmatpush.bf16.xpose.msrb.mxu0 %v1230_v61 }
 0x346   : > { %2159 = vmatmul.msk.bf16.vlgmr.msra.gmra.mxu3 %vm1144_vm7, %v2701_v37  ;;  %2161 = vmatmul.msk.bf16.vlgmr.msrb.gmra.mxu0 %vm1144_vm7, %v2708_v54 }
 0x347   : > { %1212 = vmatpush.bf16.xpose.msrb.mxu3 %v1203_v62 }
 0x356   : > { %2160 = vmatmul.msk.bf16.vlgmr.msrb.gmra.mxu3 %vm1144_vm7, %v2704_v46 }
 0x3bb   : > { %v1160_v63 = vpop.f32.mrf.mxu1 }
 0x3bc   : > { %v1246_v1 = vmul.f32 0.35355338, %v1160_v63 }
 0x3be   : > { %v1256_v2 = vadd.f32 %v1254_v0, %v1246_v1 }
 0x3c0   : > { %v1265_v3 = vsel %vm1264_vm8, %v1256_v2, -inf }
 0x3c1   : > { %1266 = vmax.xlane.f32.xlu2 %v1265_v3 }
 0x3c3   : > { %v1241_v4 = vpop.f32.mrf.mxu0  ;;  %v1162_v19 = vpop.f32.mrf.mxu1 }
 0x3c4   : > { %v1247_v21 = vmul.f32 0.35355338, %v1162_v19  ;;  %v1252_v30 = vmul.f32 0.35355338, %v1241_v4 }
 0x3c6   : > { %v1257_v26 = vadd.f32 %v1255_v12, %v1247_v21  ;;  %v1262_v34 = vadd.f32 %v1254_v0, %v1252_v30 }
 0x3c8   : > { %v1268_v33 = vsel %vm1264_vm8, %v1257_v26, -inf  ;;  %v1283_v35 = vsel %vm1264_vm8, %v1262_v34, -inf }
 0x3c9   : > { %v1187_v5 = vpop.f32.mrf.mxu3 }
 0x3ca   : > { %v1248_v6 = vmul.f32 0.35355338, %v1187_v5 }
 0x3cb   : > { %v1243_v11 = vpop.f32.mrf.mxu0 }
 0x3cc   : > { %v1258_v7 = vadd.f32 %v1254_v0, %v1248_v6  ;;  %v1253_v14 = vmul.f32 0.35355338, %v1243_v11 }
 0x3ce   : > { %v1271_v8 = vsel %vm1264_vm8, %v1258_v7, -inf  ;;  %v2732_v18 = vadd.f32 %v1255_v12, %v1253_v14 }
 0x3cf   : > { %1272 = vmax.xlane.f32.xlu0 %v1271_v8 }
 0x3d0   : > { %v1286_v23 = vsel %vm1264_vm8, %v2732_v18, -inf }
 0x3d1   : > { %v1189_v9 = vpop.f32.mrf.mxu3 }
 0x3d2   : > { %v1249_v10 = vmul.f32 0.35355338, %v1189_v9 }
 0x3d4   : > { %v1259_v13 = vadd.f32 %v1255_v12, %v1249_v10 }
 0x3d6   : > { %v1274_v15 = vsel %vm1264_vm8, %v1259_v13, -inf }
 0x3d7   : > { %1275 = vmax.xlane.f32.xlu2 %v1274_v15 }
 0x3d9   : > { %v1214_v16 = vpop.f32.mrf.mxu3 }
 0x3da   : > { %v1250_v17 = vmul.f32 0.35355338, %v1214_v16 }
 0x3dc   : > { %v1260_v20 = vadd.f32 %v1254_v0, %v1250_v17 }
 0x3de   : > { %v1277_v22 = vsel %vm1264_vm8, %v1260_v20, -inf }
 0x3df   : > { %1278 = vmax.xlane.f32.xlu1 %v1277_v22  ;;  %1287 = vmax.xlane.f32.xlu2 %v1286_v23 }
 0x3e1   : > { %v1216_v24 = vpop.f32.mrf.mxu3 }
 0x3e2   : > { %v1251_v25 = vmul.f32 0.35355338, %v1216_v24 }
 0x3e4   : > { %v1261_v28 = vadd.f32 %v1255_v12, %v1251_v25 }
 0x3e6   : > { %v1280_v32 = vsel %vm1264_vm8, %v1261_v28, -inf }
 0x3e7   : > { %1281 = vmax.xlane.f32.xlu0 %v1280_v32  ;;  %1269 = vmax.xlane.f32.xlu1 %v1268_v33 }
 0x3ef   : > { %1284 = vmax.xlane.f32.xlu0 %v1283_v35 }
 0x434   : > { %v1267_v36 = vpop.xlane.xlu2 %1266 }
 0x435   : > { %v1289_v38 = vsub.f32 %v1256_v2, %v1267_v36 }
 0x437   : > { %v1297_v40 = vmul.f32 1.442695, %v1289_v38 }
 0x439   : > { %2316 = vpow2.f32 %v1297_v40 }
 0x43f   : > { %v2740_v41 = vpop.eup %2316 }
 0x440   : > { %v1313_v42 = vsel %vm1264_vm8, %v2740_v41, 0.0 }
 0x441   : > { %1314 = vadd.xlane.f32.xlu0 %v1313_v42 }
 0x442   : > { %v1273_v43 = vpop.xlane.xlu0 %1272 }
 0x443   : > { %v1291_v44 = vsub.f32 %v1258_v7, %v1273_v43 }
 0x445   : > { %v1301_v45 = vmul.f32 1.442695, %v1291_v44 }
 0x447   : > { %2318 = vpow2.f32 %v1301_v45 }
 0x44a   : > { %v1276_v47 = vpop.xlane.xlu2 %1275 }
 0x44b   : > { %v1292_v48 = vsub.f32 %v1259_v13, %v1276_v47 }
 0x44d   : > { %v2744_v49 = vpop.eup %2318  ;;  %v1303_v50 = vmul.f32 1.442695, %v1292_v48 }
 0x44e   : > { %v1319_v51 = vsel %vm1264_vm8, %v2744_v49, 0.0 }
 0x44f   : > { %2320 = vpow2.f32 %v1303_v50  ;;  %1320 = vadd.xlane.f32.xlu1 %v1319_v51 }
 0x452   : > { %v1279_v52 = vpop.xlane.xlu1 %1278  ;;  %v1288_v7 = vpop.xlane.xlu2 %1287 }
 0x453   : > { %v1293_v62 = vsub.f32 %v1260_v20, %v1279_v52  ;;  %v1296_v9 = vsub.f32 %v2732_v18, %v1288_v7  ;;  %v1469_v7 = vld [vmem:[%s2604_s9] sm:$0xf] }
 0x455   : > { %v2321_v53 = vpop.eup %2320  ;;  %v1305_v63 = vmul.f32 1.442695, %v1293_v62  ;;  %v1311_v11 = vmul.f32 1.442695, %v1296_v9  ;;  %v1472_v9 = vld [vmem:[%s2604_s9 + $0xc] sm:$0xf] }
 0x456   : > { %v1322_v55 = vsel %vm1264_vm8, %v2321_v53, 0.0 }
 0x457   : > { %1323 = vadd.xlane.f32.xlu0 %v1322_v55 }
 0x45a   : > { %v1282_v56 = vpop.xlane.xlu0 %1281  ;;  %v1270_v57 = vpop.xlane.xlu1 %1269 }
 0x45b   : > { %v1294_v58 = vsub.f32 %v1261_v28, %v1282_v56  ;;  %v1290_v59 = vsub.f32 %v1257_v26, %v1270_v57 }
 0x45d   : > { %v1307_v60 = vmul.f32 1.442695, %v1294_v58  ;;  %v1299_v61 = vmul.f32 1.442695, %v1290_v59 }
 0x45f   : > { %2322 = vpow2.f32 %v1307_v60 }
 0x460   : > { %2324 = vpow2.f32 %v1299_v61 }
 0x461   : > { %2326 = vpow2.f32 %v1305_v63 }
 0x462   : > { %v1285_v0 = vpop.xlane.xlu0 %1284 }
 0x463   : > { %v1295_v3 = vsub.f32 %v1262_v34, %v1285_v0 }
 0x465   : > { %v2323_v1 = vpop.eup %2322  ;;  %v1309_v6 = vmul.f32 1.442695, %v1295_v3  ;;  %v1471_v3 = vld [vmem:[%s2604_s9 + $0x8] sm:$0xf] }
 0x466   : > { %v2325_v2 = vpop.eup %2324  ;;  %v1328_v4 = vsel %vm1264_vm8, %v2323_v1, 0.0 }
 0x467   : > { %1329 = vadd.xlane.f32.xlu1 %v1328_v4  ;;  %v1316_v5 = vsel %vm1264_vm8, %v2325_v2, 0.0  ;;  %v2327_v8 = vpop.eup %2326  ;;  %2328 = vpow2.f32 %v1309_v6  ;;  %v1533_v4 = vsel %vm1481_vm9, %v1471_v3, 0 }
 0x468   : > { %1317 = vadd.xlane.f32.xlu2 %v1316_v5  ;;  %v1325_v10 = vsel %vm1264_vm8, %v2327_v8, 0.0  ;;  %2330 = vpow2.f32 %v1311_v11  ;;  %v1470_v5 = vld [vmem:[%s2604_s9 + $0x4] sm:$0xf]  ;;  %s2960_s9 = smov (!%p2213_p8), %s2959_s28 }
 0x469   : > { %v1508_v6 = vsel %vm1481_vm9, %v1470_v5, 0 }
 0x46b   : > { %1416 = vrot.lane.b32.xlu0 %v2704_v46, %s2417_s3 }
 0x46d   : > { %v2329_v12 = vpop.eup %2328 }
 0x46e   : > { %v1331_v13 = vsel %vm1264_vm8, %v2329_v12, 0.0  ;;  %v2331_v14 = vpop.eup %2330 }
 0x46f   : > { %v1334_v15 = vsel %vm1264_vm8, %v2331_v14, 0.0 }
 0x470   : > { %1326 = vadd.xlane.f32.xlu2 %v1325_v10  ;;  %v1558_v10 = vsel %vm1481_vm9, %v1472_v9, 0 }
 0x473   : > { %1441 = vrot.lane.b32.xlu0 %v2708_v54, %s2417_s3 }
 0x478   : > { %1332 = vadd.xlane.f32.xlu2 %v1331_v13 }
 0x480   : > { %1335 = vadd.xlane.f32.xlu2 %v1334_v15  ;;  %1391 = vrot.lane.b32.xlu1 %v2701_v37, %s2417_s3 }
 0x498   : > { %1366 = vrot.lane.b32.xlu2 %v2699_v27, %s2417_s3 }
 0x4b4   : > { %v1315_v46 = vpop.xlane.xlu0 %1314 }
 0x4c2   : > { %v1321_v16 = vpop.xlane.xlu1 %1320 }
 0x4ca   : > { %v1324_v17 = vpop.xlane.xlu0 %1323 }
 0x4da   : > { %v1330_v18 = vpop.xlane.xlu1 %1329 }
 0x4db   : > { %v1318_v19 = vpop.xlane.xlu2 %1317  ;;  %2332 = vrcp.f32 %v1330_v18 }
 0x4dc   : > { %2334 = vrcp.f32 %v1324_v17 }
 0x4dd   : > { %v1417_v20 = vpop.permute.xlu0 %1416  ;;  %2336 = vrcp.f32 %v1321_v16 }
 0x4de   : > { %1429 = vmatpush.bf16.msra.mxu3 %v1417_v20 }
 0x4e1   : > { %v2333_v21 = vpop.eup %2332 }
 0x4e2   : > { %v2335_v22 = vpop.eup %2334  ;;  %v1350_v37 = vmul.f32 %v2333_v21, %v2323_v1  ;;  %1542 = vmatpush.bf16.msrb.mxu3 %v1533_v4 }
 0x4e3   : > { %v1327_v54 = vpop.xlane.xlu2 %1326  ;;  %v2337_v24 = vpop.eup %2336  ;;  %v1348_v27 = vmul.f32 %v2335_v22, %v2321_v53 }
 0x4e4   : > { %2338 = vrcp.f32 %v1327_v54  ;;  %v1347_v26 = vmul.f32 %v2337_v24, %v2744_v49  ;;  %v1358_v28 = vpack.c.bf16 %v1350_v37, %v1350_v37 }
 0x4e5   : > { %v1442_v23 = vpop.permute.xlu0 %1441  ;;  %2340 = vrcp.f32 %v1318_v19  ;;  %v1356_v33 = vpack.c.bf16 %v1348_v27, %v1348_v27 }
 0x4e6   : > { %1454 = vmatpush.bf16.msra.mxu0 %v1442_v23  ;;  %2342 = vrcp.f32 %v1315_v46  ;;  %v1355_v36 = vpack.c.bf16 %v1347_v26, %v1347_v26  ;;  %v1414_v38 = vunpack.c.l.b16 %v1358_v28 }
 0x4e7   : > { %v1389_v43 = vunpack.c.l.b16 %v1356_v33 }
 0x4e8   : > { %v1388_v48 = vunpack.c.l.b16 %v1355_v36 }
 0x4ea   : > { %v2339_v25 = vpop.eup %2338  ;;  %v1390_v52 = vpack.c.b16 %v1389_v43, %v1388_v48  ;;  %1567 = vmatpush.bf16.msrb.mxu0 %v1558_v10 }
 0x4eb   : > { %v1349_v30 = vmul.f32 %v2339_v25, %v2327_v8  ;;  %v1333_v32 = vpop.xlane.xlu2 %1332  ;;  %v2341_v35 = vpop.eup %2340  ;;  %v1483_v8 = vsel %vm1481_vm9, %v1469_v7, 0 }
 0x4ec   : > { %2344 = vrcp.f32 %v1333_v32  ;;  %v2343_v42 = vpop.eup %2342  ;;  %v1346_v44 = vmul.f32 %v2341_v35, %v2325_v2 }
 0x4ed   : > { %v1357_v34 = vpack.c.bf16 %v1349_v30, %v1349_v30  ;;  %v1345_v50 = vmul.f32 %v2343_v42, %v2740_v41 }
 0x4ee   : > { %v1354_v53 = vpack.c.bf16 %v1346_v44, %v1346_v44 }
 0x4ef   : > { %v1413_v40 = vunpack.c.l.b16 %v1357_v34  ;;  %v1353_v55 = vpack.c.bf16 %v1345_v50, %v1345_v50 }
 0x4f0   : > { %v1364_v57 = vunpack.c.l.b16 %v1354_v53 }
 0x4f1   : > { %v1415_v45 = vpack.c.b16 %v1414_v38, %v1413_v40  ;;  %v1363_v59 = vunpack.c.l.b16 %v1353_v55  ;;  %v2305_v55 = vld [vmem:[%s2954_s27] ss:$0 sm:$0xff] }
 0x4f2   : > { %v1392_v47 = vpop.permute.xlu1 %1391  ;;  %v2345_v51 = vpop.eup %2344 }
 0x4f3   : > { %2164 = vmatmul.msk.bf16.vlgmr.msra.gmra.mxu3 %vm1264_vm8, %v1415_v45  ;;  %v1336_v49 = vpop.xlane.xlu2 %1335  ;;  %1404 = vmatpush.bf16.msra.mxu2 %v1392_v47  ;;  %v1351_v56 = vmul.f32 %v2345_v51, %v2329_v12  ;;  %v1365_v63 = vpack.c.b16 %v1364_v57, %v1363_v59 }
 0x4f4   : > { %2346 = vrcp.f32 %v1336_v49 }
 0x4f5   : > { %v1359_v60 = vpack.c.bf16 %v1351_v56, %v1351_v56 }
 0x4f6   : > { %2163 = vmatmul.msk.bf16.vlgmr.msra.gmra.mxu2 %vm1264_vm8, %v1390_v52 }
 0x4f7   : > { %v1438_v0 = vunpack.c.l.b16 %v1359_v60  ;;  %1517 = vmatpush.bf16.msrb.mxu2 %v1508_v6 }
 0x4fa   : > { %v2347_v58 = vpop.eup %2346 }
 0x4fb   : > { %v1352_v61 = vmul.f32 %v2347_v58, %v2331_v14  ;;  %v1367_v41 = vpop.permute.xlu2 %1366 }
 0x4fc   : > { %1379 = vmatpush.bf16.msrb.mxu1 %v1367_v41 }
 0x4fd   : > { %v1360_v62 = vpack.c.bf16 %v1352_v61, %v1352_v61 }
 0x4ff   : > { %v1439_v1 = vunpack.c.l.b16 %v1360_v62  ;;  %2162 = vmatmul.msk.bf16.vlgmr.msrb.gmra.mxu1 %vm1264_vm8, %v1365_v63 }
 0x500   : > { %1492 = vmatpush.bf16.msra.mxu1 %v1483_v8 }
 0x501   : > { %v1440_v2 = vpack.c.b16 %v1439_v1, %v1438_v0 }
 0x503   : > { %2165 = vmatmul.msk.bf16.vlgmr.msra.gmra.mxu0 %vm1264_vm8, %v1440_v2 }
 0x576   : > { %v1431_v11 = vpop.f32.mrf.mxu3 }
 0x577   : > { %v1465_v14 = vpack.c.bf16 %v1431_v11, %v1431_v11 }
 0x579   : > { %v1406_v12 = vpop.f32.mrf.mxu2  ;;  %v1526_v18 = vunpack.c.l.b16 %v1465_v14 }
 0x57a   : > { %v1463_v16 = vpack.c.bf16 %v1406_v12, %v1406_v12 }
 0x57c   : > { %v1381_v13 = vpop.f32.mrf.mxu1  ;;  %v1501_v23 = vunpack.c.l.b16 %v1463_v16 }
 0x57d   : > { %v1461_v21 = vpack.c.bf16 %v1381_v13, %v1381_v13 }
 0x57e   : > { %v1433_v15 = vpop.f32.mrf.mxu3 }
 0x57f   : > { %v1466_v46 = vpack.c.bf16 %v1433_v15, %v1433_v15  ;;  %v1475_v26 = vunpack.c.l.b16 %v1461_v21  ;;  %v2225_v15 = vld [vmem:[%s2621_s1 + $0x8] sm:$0xff] }
 0x580   : > { %v1456_v17 = vpop.f32.mrf.mxu0  ;;  %1682 = vmatpush.bf16.msrb.mxu1 %v2225_v15 }
 0x581   : > { %v1527_v19 = vunpack.c.l.b16 %v1466_v46  ;;  %v1408_v20 = vpop.f32.mrf.mxu2  ;;  %v1467_v28 = vpack.c.bf16 %v1456_v17, %v1456_v17 }
 0x582   : > { %v1464_v54 = vpack.c.bf16 %v1408_v20, %v1408_v20 }
 0x583   : > { %v1528_v22 = vpack.c.b16 %v1527_v19, %v1526_v18  ;;  %v1551_v35 = vunpack.c.l.b16 %v1467_v28  ;;  %v2224_v18 = vld [vmem:[%s2621_s1] sm:$0xff] }
 0x584   : > { %v1502_v24 = vunpack.c.l.b16 %v1464_v54  ;;  %v1383_v37 = vpop.f32.mrf.mxu1  ;;  %1683 = vmatpush.bf16.msrb.mxu1 %v2224_v18 }
 0x585   : > { %v1462_v27 = vpack.c.bf16 %v1383_v37, %v1383_v37  ;;  %2168 = vmatmul.msk.bf16.vlgmr.msrb.gmra.mxu3 %vm1144_vm7, %v1528_v22 }
 0x586   : > { %v1503_v25 = vpack.c.b16 %v1502_v24, %v1501_v23 }
 0x587   : > { %v1476_v30 = vunpack.c.l.b16 %v1462_v27 }
 0x588   : > { %v1458_v32 = vpop.f32.mrf.mxu0  ;;  %2167 = vmatmul.msk.bf16.vlgmr.msrb.gmra.mxu2 %vm1144_vm7, %v1503_v25 }
 0x589   : > { %v1477_v33 = vpack.c.b16 %v1476_v30, %v1475_v26  ;;  %v1468_v34 = vpack.c.bf16 %v1458_v32, %v1458_v32 }
 0x58b   : > { %v1552_v36 = vunpack.c.l.b16 %v1468_v34  ;;  %2166 = vmatmul.msk.bf16.vlgmr.msra.gmra.mxu1 %vm1144_vm7, %v1477_v33  ;;  %v2306_v34 = vld [vmem:[%s2955_s0] ss:$0 sm:$0xff] }
 0x58d   : > { %v1553_v38 = vpack.c.b16 %v1552_v36, %v1551_v35 }
 0x58f   : > { %2169 = vmatmul.msk.bf16.vlgmr.msrb.gmra.mxu0 %vm1144_vm7, %v1553_v38 }
 0x608   : > { %v1494_v40 = vpop.f32.mrf.mxu1  ;;  %v1544_v42 = vpop.f32.mrf.mxu3 }
 0x609   : > { %v1574_v44 = vsel %vm1009_vm15, %v1494_v40, 0.0  ;;  %v1577_v50 = vsel %vm1009_vm15, %v1544_v42, 0.0  ;;  %v2307_v40 = vld [vmem:[%s2956_s22] ss:$0 sm:$0xff] }
 0x60b   : > { %v1519_v43 = vpop.f32.mrf.mxu2 }
 0x60c   : > { %v1575_v45 = vsel %vm1009_vm15, %v1519_v43, 0.0  ;;  %v1569_v47 = vpop.f32.mrf.mxu0 }
 0x60d   : > { %v1576_v48 = vadd.f32 %v1575_v45, %v1574_v44  ;;  %v1579_v51 = vsel %vm1009_vm15, %v1569_v47, 0.0 }
 0x60f   : > { %v1578_v49 = vadd.f32 %v1577_v50, %v1576_v48  ;;  %v2233_v50 = vld [vmem:[%s2631_s21 + $0x38] sm:$0xff] }
 0x610   : > { %v1496_v53 = vpop.f32.mrf.mxu1  ;;  %v1546_v57 = vpop.f32.mrf.mxu3  ;;  %1797 = vmatpush.bf16.msra.mxu2 %v2233_v50 }
 0x611   : > { %v1580_v52 = vadd.f32 %v1579_v51, %v1578_v49  ;;  %v1581_v59 = vsel %vm1009_vm15, %v1496_v53, 0.0  ;;  %v1584_v63 = vsel %vm1009_vm15, %v1546_v57, 0.0  ;;  %v2232_v49 = vld [vmem:[%s2631_s21 + $0x30] sm:$0xff]  ;;  %v2231_v51 = vld [vmem:[%s2631_s21 + $0x28] sm:$0xff]  ;;  %v2308_v53 = vld [vmem:[%s920_s30] ss:$0 sm:$0xff] }
 0x613   : > { %v1588_v56 = vadd.f32 %v1580_v52, %v2663_v29  ;;  %v1521_v58 = vpop.f32.mrf.mxu2  ;;  %v2230_v52 = vld [vmem:[%s2631_s21 + $0x20] sm:$0xff] }
 0x614   : > { %v1582_v60 = vsel %vm1009_vm15, %v1521_v58, 0.0  ;;  %v1571_v41 = vpop.f32.mrf.mxu0  ;;  %1798 = vmatpush.bf16.msra.mxu2 %v2232_v49  ;;  %v2228_v58 = vld [vmem:[%s2631_s21 + $0x10] sm:$0xff] }
 0x615   : > { %v1583_v61 = vadd.f32 %v1582_v60, %v1581_v59  ;;  %v2785_v62 = vadd.f32 %v2305_v55, %v1588_v56  ;;  %v1586_v2 = vsel %vm1009_vm15, %v1571_v41, 0.0 }
 0x617   : > { %v1585_v0 = vadd.f32 %v1584_v63, %v1583_v61  ;;  %v1598_v1 = vsel %vm1009_vm15, %v2785_v62, 0.0  ;;  %v2227_v61 = vld [vmem:[%s2631_s21 + $0x8] sm:$0xff] }
 0x618   : > { %1599 = vadd.xlane.f32.xlu1 %v1598_v1  ;;  %1799 = vmatpush.bf16.msra.mxu2 %v2231_v51 }
 0x619   : > { %v1587_v29 = vadd.f32 %v1586_v2, %v1585_v0  ;;  %v2226_v0 = vld [vmem:[%s2631_s21] sm:$0xff] }
 0x61b   : > { %v1589_v3 = vadd.f32 %v1587_v29, %v2667_v31 }
 0x61c   : > { %1800 = vmatpush.bf16.msra.mxu2 %v2230_v52 }
 0x61d   : > { %v2792_v4 = vadd.f32 %v2305_v55, %v1589_v3  ;;  %v2229_v55 = vld [vmem:[%s2631_s21 + $0x18] sm:$0xff] }
 0x61f   : > { %v1601_v5 = vsel %vm1009_vm15, %v2792_v4, 0.0 }
 0x620   : > { %1602 = vadd.xlane.f32.xlu0 %v1601_v5  ;;  %1801 = vmatpush.bf16.msra.mxu2 %v2229_v55 }
 0x624   : > { %1802 = vmatpush.bf16.msra.mxu2 %v2228_v58 }
 0x628   : > { %1803 = vmatpush.bf16.msra.mxu2 %v2227_v61 }
 0x62c   : > { %1804 = vmatpush.bf16.msra.mxu2 %v2226_v0 }
 0x68b   : > { %v1600_v6 = vpop.xlane.xlu1 %1599 }
 0x68c   : > { %v1604_v7 = vmul.f32 %v1600_v6, %v2671_v39 }
 0x68e   : > { %v1606_v8 = vsub.f32 %v2785_v62, %v1604_v7 }
 0x690   : > { %v1608_v9 = vmul.f32 %v1606_v8, %v1606_v8 }
 0x692   : > { %v1610_v10 = vsel %vm1009_vm15, %v1608_v9, 0.0 }
 0x693   : > { %1611 = vadd.xlane.f32.xlu2 %v1610_v10  ;;  %v1603_v11 = vpop.xlane.xlu0 %1602 }
 0x694   : > { %v1605_v31 = vmul.f32 %v1603_v11, %v2671_v39 }
 0x696   : > { %v1607_v12 = vsub.f32 %v2792_v4, %v1605_v31 }
 0x698   : > { %v1609_v13 = vmul.f32 %v1607_v12, %v1607_v12 }
 0x69a   : > { %v1613_v14 = vsel %vm1009_vm15, %v1609_v13, 0.0 }
 0x69b   : > { %1614 = vadd.xlane.f32.xlu1 %v1613_v14 }
 0x706   : > { %v1612_v46 = vpop.xlane.xlu2 %1611 }
 0x707   : > { %v1616_v16 = vmul.f32 %v1612_v46, %v2671_v39 }
 0x709   : > { %v1618_v17 = vadd.f32 1e-05, %v1616_v16 }
 0x70b   : > { %2348 = vrsqrt.f32 %v1618_v17  ;;  %vm1626_vm11 = vweird.f32 %v1618_v17 }
 0x70e   : > { %v1615_v19 = vpop.xlane.xlu1 %1614 }
 0x70f   : > { %v1617_v20 = vmul.f32 %v1615_v19, %v2671_v39 }
 0x711   : > { %v2349_v54 = vpop.eup %2348  ;;  %v1619_v21 = vadd.f32 1e-05, %v1617_v20 }
 0x712   : > { %v1621_v22 = vmul.f32 %v2349_v54, %v1618_v17  ;;  %vm1627_vm10 = vweird.f32 %v2349_v54 }
 0x713   : > { %2350 = vrsqrt.f32 %v1619_v21  ;;  %vm1628_vm12 = vmor %vm1626_vm11, %vm1627_vm10  ;;  %vm1636_vm14 = vweird.f32 %v1619_v21 }
 0x714   : > { %v1622_v23 = vmul.f32 %v2349_v54, %v1621_v22 }
 0x716   : > { %v1623_v24 = vmul.f32 0.5, %v1622_v23 }
 0x718   : > { %v1624_v37 = vsub.f32 1.5, %v1623_v24 }
 0x719   : > { %v2351_v27 = vpop.eup %2350 }
 0x71a   : > { %v1625_v25 = vmul.f32 %v2349_v54, %v1624_v37  ;;  %v1631_v26 = vmul.f32 %v2351_v27, %v1619_v21  ;;  %vm1637_vm13 = vweird.f32 %v2351_v27 }
 0x71b   : > { %vm1638_vm0 = vmor %vm1636_vm14, %vm1637_vm13 }
 0x71c   : > { %v1632_v28 = vmul.f32 %v2351_v27, %v1631_v26  ;;  %v1629_v30 = vsel %vm1628_vm12, %v2349_v54, %v1625_v25  ;;  %v2309_v25 = vld [vmem:[%s928_s8] ss:$0 sm:$0xff]  ;;  %s2958_s8 = sld [smem:[#allocation23_spill]] (!%p2213_p8) }
 0x71d   : > { %v1640_v35 = vmul.f32 %v1629_v30, %v1606_v8 }
 0x71e   : > { %v1633_v32 = vmul.f32 0.5, %v1632_v28 }
 0x71f   : > { %v1645_v42 = vmul.f32 %v2306_v34, %v1640_v35 }
 0x720   : > { %v1634_v33 = vsub.f32 1.5, %v1633_v32 }
 0x721   : > { %v1650_v45 = vadd.f32 %v2307_v40, %v1645_v42 }
 0x722   : > { %v1635_v36 = vmul.f32 %v2351_v27, %v1634_v33 }
 0x724   : > { %v1639_v38 = vsel %vm1638_vm0, %v2351_v27, %v1635_v36 }
 0x725   : > { %v1641_v43 = vmul.f32 %v1639_v38, %v1607_v12 }
 0x727   : > { %v1646_v44 = vmul.f32 %v2306_v34, %v1641_v43 }
 0x729   : > { %v1651_v47 = vadd.f32 %v2307_v40, %v1646_v44 }
 0x72b   : > { %v1652_v48 = vpack.c.bf16 %v1651_v47, %v1650_v45 }
 0x72d   : > { %2178 = vmatmul.msk.bf16.vlgmr.msrb.gmra.mxu1 %vm1009_vm15, %v1652_v48 }
 0x7aa   : > { %v1685_v56 = vpop.f32.mrf.mxu1 }
 0x7ab   : > { %v1686_v57 = vadd.f32 %v2308_v53, %v1685_v56 }
 0x7ad   : > { %v2179_v59 = vmul.f32 -1.702, %v1686_v57 }
 0x7af   : > { %v1694_v60 = vmul.f32 1.442695, %v2179_v59 }
 0x7b1   : > { %2352 = vpow2.f32 %v1694_v60 }
 0x7b2   : > { %v1687_v41 = vpop.f32.mrf.mxu1 }
 0x7b3   : > { %v1688_v63 = vadd.f32 %v2308_v53, %v1687_v41 }
 0x7b5   : > { %v2180_v1 = vmul.f32 -1.702, %v1688_v63 }
 0x7b7   : > { %v2353_v2 = vpop.eup %2352  ;;  %v1696_v29 = vmul.f32 1.442695, %v2180_v1 }
 0x7b8   : > { %v1698_v3 = vadd.f32 1.0, %v2353_v2 }
 0x7b9   : > { %2354 = vpow2.f32 %v1696_v29 }
 0x7ba   : > { %2356 = vrcp.f32 %v1698_v3  ;;  %v1711_v13 = vand.u32 2147483648, %v1698_v3  ;;  %vm1705_vm2 = vweird.f32 %v1698_v3  ;;  %v1709_v14 = vand.u32 2147483647, %v1698_v3 }
 0x7bc   : > { %v1712_v19 = vor.u32 1.1754944e-38, %v1711_v13  ;;  %vm1710_vm5 = vcmp.eq.f32.partialorder %v1709_v14, 8.507059e+37 }
 0x7bf   : > { %v2355_v5 = vpop.eup %2354 }
 0x7c0   : > { %v2357_v6 = vpop.eup %2356  ;;  %v1699_v7 = vadd.f32 1.0, %v2355_v5 }
 0x7c1   : > { %v1701_v8 = vmul.f32 %v2357_v6, %v1698_v3  ;;  %vm1706_vm1 = vweird.f32 %v2357_v6 }
 0x7c2   : > { %2358 = vrcp.f32 %v1699_v7  ;;  %vm1707_vm3 = vmor %vm1705_vm2, %vm1706_vm1  ;;  %v1726_v46 = vand.u32 2147483648, %v1699_v7  ;;  %v1724_v18 = vand.u32 2147483647, %v1699_v7  ;;  %vm1720_vm6 = vweird.f32 %v1699_v7 }
 0x7c3   : > { %v1702_v9 = vsub.f32 1.0, %v1701_v8 }
 0x7c4   : > { %v1727_v21 = vor.u32 1.1754944e-38, %v1726_v46  ;;  %vm1725_vm8 = vcmp.eq.f32.partialorder %v1724_v18, 8.507059e+37 }
 0x7c5   : > { %v1703_v10 = vmul.f32 %v2357_v6, %v1702_v9 }
 0x7c7   : > { %v1704_v31 = vadd.f32 %v2357_v6, %v1703_v10 }
 0x7c8   : > { %v2359_v11 = vpop.eup %2358 }
 0x7c9   : > { %v1716_v12 = vmul.f32 %v2359_v11, %v1699_v7  ;;  %v1708_v16 = vsel %vm1707_vm3, %v2357_v6, %v1704_v31  ;;  %vm1721_vm4 = vweird.f32 %v2359_v11 }
 0x7ca   : > { %v1713_v54 = vsel %vm1710_vm5, %v1712_v19, %v1708_v16  ;;  %vm1722_vm7 = vmor %vm1720_vm6, %vm1721_vm4 }
 0x7cb   : > { %v1717_v15 = vsub.f32 1.0, %v1716_v12  ;;  %v1730_v24 = vmul.f32 %v1713_v54, %v1686_v57 }
 0x7cd   : > { %v1718_v17 = vmul.f32 %v2359_v11, %v1717_v15 }
 0x7cf   : > { %v1719_v20 = vadd.f32 %v2359_v11, %v1718_v17 }
 0x7d1   : > { %v1723_v22 = vsel %vm1722_vm7, %v2359_v11, %v1719_v20 }
 0x7d2   : > { %v1728_v23 = vsel %vm1725_vm8, %v1727_v21, %v1723_v22 }
 0x7d3   : > { %v1731_v37 = vmul.f32 %v1728_v23, %v1688_v63 }
 0x7d5   : > { %v1732_v27 = vpack.c.bf16 %v1731_v37, %v1730_v24 }
 0x7d7   : > { %1805 = vmatmul.bf16.vlgmr.msra.gmra.mxu2 %v1732_v27 }
 0x85a   : > { %v1806_v26 = vpop.f32.mrf.mxu2 }
 0x85b   : > { %v1811_v28 = vadd.f32 %v1806_v26, %v2785_v62 }
 0x85d   : > { %v1817_v30 = vadd.f32 %v2309_v25, %v1811_v28 }
 0x85f   : > { %1819 = vst.msk [vmem:[#allocation2] sm:$0xff] %vm1009_vm15, %v1817_v30 }
 0x862   : > { %v1808_v32 = vpop.f32.mrf.mxu2 }
 0x863   : > { %v1812_v33 = vadd.f32 %v1808_v32, %v2792_v4  ;;  %1824 = sbr.rel (%p2213_p8) target bundleno = 2431 (0x97f), region = 116 }
 0x865   : > { %v1818_v34 = vadd.f32 %v2309_v25, %v1812_v33 }
 0x867   : > { %1820 = vst.msk [vmem:[#allocation2 + $0x8] sm:$0xff] %vm1009_vm15, %v1818_v34 }
 0x868   : > { %v1827_v35 = vld [vmem:[#allocation2 + $0x1] sm:$0x7f]  ;;  %vm1830_vm9 = vcmask 260096   ;;  %v2418_v42 = vmov 0   ;;  %v2214_v43 = vld [vmem:[%s2590_s25 + $0x8] sm:$0x7f] }
 0x869   : > { %v1831_v36 = vsel %vm1830_vm9, %v1827_v35, 0.0  ;;  %v1825_v40 = vld [vmem:[%s2590_s25] sm:$0x7f]  ;;  %2360 = vset.pattern.permute.xlu2 %v2418_v42  ;;  %2361 = vset.pattern.permute.xlu0 %v2418_v42  ;;  %vm1871_vm15 = vcmp.gt.f32.partialorder %v2214_v43, 0.5  ;;  %v1861_v14 = vld [vmem:[#allocation3] sm:$0x7f] }
 0x86a   : > { %1832 = vadd.xlane.f32.xlu0 %v1831_v36  ;;  %vm1826_vm10 = vcmp.gt.f32.partialorder %v1825_v40, 0.5  ;;  %v1907_v44 = vsel %vm1871_vm15, 1, %v2418_v42  ;;  %v2362_v7 = vld [vmem:[%s2958_s8] ss:$0 sm:$0xff]  ;;  %v1906_v22 = vld [vmem:[#allocation3 + $0x8] sm:$0x7f] }
 0x86b   : > { %v1862_v4 = vsel %vm1826_vm10, 1, %v2418_v42  ;;  %v2363_v10 = vld [vmem:[%s2959_s28] ss:$0 sm:$0xff] }
 0x86c   : > { %1864 = vperm.xlu2 %2360, %v1862_v4   ;;  %v2364_v17 = vld [vmem:[%s2958_s8] ss:$0 sm:$0xff] }
 0x86d   : > { %v2365_v20 = vld [vmem:[%s2960_s9] ss:$0 sm:$0xff] }
 0x86e   : > { %v1872_v62 = vld [vmem:[#allocation2 + $0x9] sm:$0x7f] }
 0x86f   : > { %v1875_v38 = vsel %vm1830_vm9, %v1872_v62, 0.0 }
 0x872   : > { %1876 = vadd.xlane.f32.xlu0 %v1875_v38 }
 0x874   : > { %1909 = vperm.xlu2 %2360, %v1907_v44  }
 0x8c6   : > { %v1865_v11 = vpop.permute.xlu2 %1864 }
 0x8c7   : > { %vm1866_vm0 = vcmp.eq.s32.totalorder %v1865_v11, 1 }
 0x8ce   : > { %v1910_v21 = vpop.permute.xlu2 %1909 }
 0x8cf   : > { %vm1911_vm3 = vcmp.eq.s32.totalorder %v1910_v21, 1 }
 0x8dd   : > { %v1833_v45 = vpop.xlane.xlu0 %1832 }
 0x8de   : > { %v1834_v47 = vmul.f32 %v1833_v45, %v2671_v39 }
 0x8e0   : > { %v1835_v48 = vsub.f32 %v1827_v35, %v1834_v47 }
 0x8e2   : > { %v1836_v50 = vmul.f32 %v1835_v48, %v1835_v48 }
 0x8e4   : > { %v1837_v49 = vsel %vm1830_vm9, %v1836_v50, 0.0 }
 0x8e5   : > { %1838 = vadd.xlane.f32.xlu1 %v1837_v49  ;;  %v1877_v51 = vpop.xlane.xlu0 %1876 }
 0x8e6   : > { %v1878_v52 = vmul.f32 %v1877_v51, %v2671_v39 }
 0x8e8   : > { %v1879_v53 = vsub.f32 %v1872_v62, %v1878_v52 }
 0x8ea   : > { %v1880_v55 = vmul.f32 %v1879_v53, %v1879_v53 }
 0x8ec   : > { %v1881_v56 = vsel %vm1830_vm9, %v1880_v55, 0.0 }
 0x8ed   : > { %1882 = vadd.xlane.f32.xlu1 %v1881_v56 }
 0x958   : > { %v1839_v57 = vpop.xlane.xlu1 %1838 }
 0x959   : > { %v1840_v58 = vmul.f32 %v1839_v57, %v2671_v39 }
 0x95b   : > { %v1841_v59 = vadd.f32 1e-05, %v1840_v58 }
 0x95d   : > { %2366 = vrsqrt.f32 %v1841_v59  ;;  %vm1848_vm12 = vweird.f32 %v1841_v59 }
 0x960   : > { %v1883_v60 = vpop.xlane.xlu1 %1882 }
 0x961   : > { %v1884_v61 = vmul.f32 %v1883_v60, %v2671_v39 }
 0x963   : > { %v2367_v41 = vpop.eup %2366  ;;  %v1885_v63 = vadd.f32 1e-05, %v1884_v61 }
 0x964   : > { %v1843_v0 = vmul.f32 %v2367_v41, %v1841_v59  ;;  %vm1849_vm11 = vweird.f32 %v2367_v41 }
 0x965   : > { %2368 = vrsqrt.f32 %v1885_v63  ;;  %vm1850_vm13 = vmor %vm1848_vm12, %vm1849_vm11  ;;  %vm1892_vm1 = vweird.f32 %v1885_v63 }
 0x966   : > { %v1844_v1 = vmul.f32 %v2367_v41, %v1843_v0 }
 0x968   : > { %v1845_v2 = vmul.f32 0.5, %v1844_v1 }
 0x96a   : > { %v1846_v29 = vsub.f32 1.5, %v1845_v2 }
 0x96b   : > { %v2369_v3 = vpop.eup %2368 }
 0x96c   : > { %v1847_v5 = vmul.f32 %v2367_v41, %v1846_v29  ;;  %v1887_v6 = vmul.f32 %v2369_v3, %v1885_v63  ;;  %vm1893_vm14 = vweird.f32 %v2369_v3 }
 0x96d   : > { %vm1894_vm2 = vmor %vm1892_vm1, %vm1893_vm14 }
 0x96e   : > { %v1851_v8 = vsel %vm1850_vm13, %v2367_v41, %v1847_v5  ;;  %v1888_v9 = vmul.f32 %v2369_v3, %v1887_v6 }
 0x96f   : > { %v1852_v39 = vmul.f32 %v1851_v8, %v1835_v48 }
 0x970   : > { %v1889_v31 = vmul.f32 0.5, %v1888_v9 }
 0x971   : > { %v1856_v12 = vmul.f32 %v2362_v7, %v1852_v39 }
 0x972   : > { %v1890_v13 = vsub.f32 1.5, %v1889_v31 }
 0x973   : > { %v1860_v15 = vadd.f32 %v2363_v10, %v1856_v12 }
 0x974   : > { %v1891_v46 = vmul.f32 %v2369_v3, %v1890_v13 }
 0x975   : > { %v1867_v16 = vsel %vm1866_vm0, %v1860_v15, %v1861_v14 }
 0x976   : > { %v1895_v18 = vsel %vm1894_vm2, %v2369_v3, %v1891_v46  ;;  %1868 = vst.msk [vmem:[%s2640_s2] sm:$0x7f] %vm1830_vm9, %v1867_v16 }
 0x977   : > { %v1896_v19 = vmul.f32 %v1895_v18, %v1879_v53 }
 0x979   : > { %v1900_v54 = vmul.f32 %v2364_v17, %v1896_v19 }
 0x97b   : > { %v1904_v23 = vadd.f32 %v2365_v20, %v1900_v54 }
 0x97d   : > { %v1912_v24 = vsel %vm1911_vm3, %v1904_v23, %v1906_v22 }
 0x97e   : > { %2215 = vst.msk [vmem:[%s2640_s2 + $0x8] sm:$0x7f] %vm1830_vm9, %v1912_v24 }
 0x97f PF: > { %s2961_s29 = sld [smem:[#allocation7_spill]] }
 0x980   : > { %s2962_s3 = sld [smem:[#allocation5_spill]] }
 0x981   : > { %s2963_s28 = sld [smem:[#allocation6_spill]] }
 0x982   : > { %s2965_s30 = sld [smem:[#allocation9_spill]] }
 0x985   : > { %s32_s4 = sadd.s32 1, %s2961_s29   ;;  %s2964_s29 = sld [smem:[#allocation8_spill]] }
 0x986   : > { %p29_p9 = scmp.ge.s32.totalorder %s32_s4, 6  }
 0x988   :  { %31 = sbr.rel (!%p29_p9) target bundleno = 16 (0x10), region = 192 }

</bundles_post_ra>
